<compile_context>
chip_gen: v7x
topology: tpu7x:2x2x1
jax: 0.10.0
libtpu: 0.0.40
codegen_flags: <defaults>
</compile_context>

<pallas_src>
import numpy as np

import jax
import jax.numpy as jnp
from jax.experimental import pallas as pl
from jax.experimental.pallas import tpu as pltpu


# ---------------------------------------------------------------------------
# Fused whole-network kernel (one image per grid step)
# ---------------------------------------------------------------------------
# Activation slab convention: slab[h, w*C + c] = x_nhwc[h, w, c]  (lane-dense).
#
#   conv (valid 5x5, stride 1): one dot against a K-concatenated weight
#       xk[oh, i*W*C + w*C + c] = slab[oh+i, w*C + c]      (5 shifted row slices)
#       y = ReLU(xk @ Wbig + bias)
#   2x2/stride-2 max-pool:
#       v = max(Pe @ y, Po @ y)        (vertical pair pick, tiny 0/1 selectors)
#       o = max(v @ Ae, v @ Ao)        (horizontal pair pick + lane compaction)
#   flatten (torch NCHW order folded into G1) + fc1/fc2/fc3.


def _dot(a, b):
    # bf16 inputs, f32 accumulation on the MXU.
    return jnp.dot(a, b, preferred_element_type=jnp.float32)


def _net_kernel(x_ref, w1_ref, b1_ref, p1_ref, a1_ref,
                w2_ref, b2_ref, p2_ref, a2_ref,
                g1_ref, fb1_ref, fc2w_ref, fb2_ref, fc3w_ref, fb3_ref,
                o_ref):
    bf16 = jnp.bfloat16
    x = x_ref[0]                                                   # (32, 96) bf16

    # conv1 (3->6, 5x5): single K-concatenated dot  (28,480)@(480,168)
    xk = jnp.concatenate([x[i:i + 28, :] for i in range(5)], axis=1)
    y1 = jnp.maximum(_dot(xk, w1_ref[...]) + b1_ref[...], 0.0).astype(bf16)

    # maxpool 2x2 stride 2 -> (14, 84)
    v1 = jnp.maximum(_dot(p1_ref[0], y1), _dot(p1_ref[1], y1)).astype(bf16)
    o1 = jnp.maximum(_dot(v1, a1_ref[0]), _dot(v1, a1_ref[1])).astype(bf16)

    # conv2 (6->16, 5x5): single dot  (10,420)@(420,160)
    o1k = jnp.concatenate([o1[i:i + 10, :] for i in range(5)], axis=1)
    y2 = jnp.maximum(_dot(o1k, w2_ref[...]) + b2_ref[...], 0.0).astype(bf16)

    # maxpool 2x2 stride 2 -> (5, 80)
    v2 = jnp.maximum(_dot(p2_ref[0], y2), _dot(p2_ref[1], y2)).astype(bf16)
    o2 = jnp.maximum(_dot(v2, a2_ref[0]), _dot(v2, a2_ref[1])).astype(bf16)

    # flatten (torch c*25+h*5+w order folded into g1) + fc1 + ReLU -> (1, 120)
    f = jnp.concatenate([o2[h:h + 1, :] for h in range(5)], axis=1)   # (1, 400)
    h1 = jnp.maximum(_dot(f, g1_ref[...]) + fb1_ref[...], 0.0).astype(bf16)

    # fc2 + ReLU -> (1, 84);  fc3 -> (1, 10)
    h2 = jnp.maximum(_dot(h1, fc2w_ref[...]) + fb2_ref[...], 0.0).astype(bf16)
    o_ref[0] = (_dot(h2, fc3w_ref[...]) + fb3_ref[...]).astype(o_ref.dtype)


# ---------------------------------------------------------------------------
# pallas_call wrapper: grid over batch, weights VMEM-resident (constant maps)
# ---------------------------------------------------------------------------
def _const_spec(shape):
    nd = len(shape)
    return pl.BlockSpec(tuple(shape), lambda b, _nd=nd: (0,) * _nd)


_WEIGHT_KEYS = ("w1", "b1", "p1", "a1", "w2", "b2", "p2", "a2",
                "g1", "fb1", "fc2_w", "fb2", "fc3_w", "fb3")


@jax.jit
def net_forward(x_nchw, ops):
    B = x_nchw.shape[0]
    # NCHW -> NHWC -> lane-dense per-image slab (B, 32, 32*3), stored bf16.
    x_slab = jnp.transpose(x_nchw, (0, 2, 3, 1)).reshape(B, 32, 96)
    x_slab = x_slab.astype(jnp.bfloat16)
    weights = tuple(ops[k] for k in _WEIGHT_KEYS)
    in_specs = [pl.BlockSpec((1, 32, 96), lambda b: (b, 0, 0))]
    in_specs += [_const_spec(w.shape) for w in weights]
    out = pl.pallas_call(
        _net_kernel,
        out_shape=jax.ShapeDtypeStruct((B, 1, 10), jnp.float32),
        grid=(B,),
        in_specs=in_specs,
        out_specs=pl.BlockSpec((1, 1, 10), lambda b: (b, 0, 0)),
        compiler_params=pltpu.CompilerParams(
            dimension_semantics=("parallel",)),
    )(x_slab, *weights)
    return out.reshape(B, 10)


# ---------------------------------------------------------------------------
# Parameters (PyTorch-default-style uniform init, torch weight layouts)
# ---------------------------------------------------------------------------
def _uniform(key, shape, fan_in):
    bound = 1.0 / jnp.sqrt(jnp.float32(fan_in))
    return jax.random.uniform(key, shape, jnp.float32, -bound, bound)


def init_params(key):
    ks = jax.random.split(key, 10)
    return {
        "conv1_w": _uniform(ks[0], (6, 3, 5, 5), 3 * 25),
        "conv1_b": _uniform(ks[1], (6,), 3 * 25),
        "conv2_w": _uniform(ks[2], (16, 6, 5, 5), 6 * 25),
        "conv2_b": _uniform(ks[3], (16,), 6 * 25),
        "fc1_w": _uniform(ks[4], (120, 400), 400),
        "fc1_b": _uniform(ks[5], (120,), 400),
        "fc2_w": _uniform(ks[6], (84, 120), 120),
        "fc2_b": _uniform(ks[7], (84,), 120),
        "fc3_w": _uniform(ks[8], (10, 84), 84),
        "fc3_b": _uniform(ks[9], (10,), 84),
    }


# ---------------------------------------------------------------------------
# One-time operand construction (numpy); batch-size independent
# ---------------------------------------------------------------------------
def _conv_kcat_weight(w, w_in):
    """torch (Cout,Cin,kh,kw) -> (kh*W*Cin, Wo*Cout) weight for the K-concat dot."""
    c_out, c_in, kh, kw = w.shape
    wo = w_in - kw + 1
    m = np.zeros((kh * w_in * c_in, wo * c_out), np.float32)
    for i in range(kh):
        for j in range(kw):
            blk = w[:, :, i, j].T                                  # (Cin, Cout)
            for ow in range(wo):
                r0 = (i * w_in + ow + j) * c_in
                m[r0:r0 + c_in, ow * c_out:(ow + 1) * c_out] = blk
    return m


def _pool_row_sel(h_out):
    """P[d, hp, 2*hp+d] = 1 (vertical pooling pair selector, per image)."""
    hp_n = h_out // 2
    p = np.zeros((2, hp_n, h_out), np.float32)
    for d in range(2):
        for hp in range(hp_n):
            p[d, hp, 2 * hp + d] = 1.0
    return p


def _pool_col_sel(w_out, c):
    """A[d, (2*wp+d)*C+ch, wp*C+ch] = 1 (horizontal pooling pair selector)."""
    wp_n = w_out // 2
    a = np.zeros((2, w_out * c, wp_n * c), np.float32)
    for d in range(2):
        for wp in range(wp_n):
            for ch in range(c):
                a[d, (2 * wp + d) * c + ch, wp * c + ch] = 1.0
    return a


def build_operands(params):
    p = {k: np.asarray(v, np.float32) for k, v in params.items()}
    ops_np = {
        # conv1: 32x32x3 -> 28x28x6
        "w1": _conv_kcat_weight(p["conv1_w"], 32),                 # (480, 168)
        "b1": np.tile(p["conv1_b"], 28)[None, :],                  # (1, 168)
        "p1": _pool_row_sel(28),                                   # (2, 14, 28)
        "a1": _pool_col_sel(28, 6),                                # (2, 168, 84)
        # conv2: 14x14x6 -> 10x10x16
        "w2": _conv_kcat_weight(p["conv2_w"], 14),                 # (420, 160)
        "b2": np.tile(p["conv2_b"], 10)[None, :],                  # (1, 160)
        "p2": _pool_row_sel(10),                                   # (2, 5, 10)
        "a2": _pool_col_sel(10, 16),                               # (2, 160, 80)
        # flatten + fc1: fold torch's NCHW c*25+h*5+w ordering into the weight.
        "g1": p["fc1_w"].reshape(120, 16, 5, 5)
                        .transpose(2, 3, 1, 0).reshape(400, 120),
        "fb1": p["fc1_b"][None, :],
        "fc2_w": p["fc2_w"].T.copy(), "fb2": p["fc2_b"][None, :],
        "fc3_w": p["fc3_w"].T.copy(), "fb3": p["fc3_b"][None, :],
    }
    bf16 = {"w1", "p1", "a1", "w2", "p2", "a2", "g1", "fc2_w", "fc3_w"}
    return {k: jnp.asarray(v, jnp.bfloat16 if k in bf16 else jnp.float32)
            for k, v in ops_np.items()}


if __name__ == "__main__":
    key = jax.random.PRNGKey(0)
    k_params, k_input = jax.random.split(key)
    params = init_params(k_params)
    ops = build_operands(params)            # batch-size independent
    B = 2
    # Input must be (B, 3, 32, 32) so fc1's 16*5*5 flatten lines up.
    x = jax.random.normal(k_input, (B, 3, 32, 32), dtype=jnp.float32)
    out = net_forward(x, ops)
    out = jax.block_until_ready(out)
    assert out.shape == (B, 10), out.shape
    print("KERNEL_OK")
</pallas_src>

<mosaic_0001>
module attributes {stable_mosaic.version = 11 : i64} {
  func.func @_net_kernel(%arg0: i32, %arg1: memref<1x32x96xbf16, #tpu.memory_space<vmem>>, %arg2: memref<480x168xbf16, #tpu.memory_space<vmem>>, %arg3: memref<1x168xf32, #tpu.memory_space<vmem>>, %arg4: memref<2x14x28xbf16, #tpu.memory_space<vmem>>, %arg5: memref<2x168x84xbf16, #tpu.memory_space<vmem>>, %arg6: memref<420x160xbf16, #tpu.memory_space<vmem>>, %arg7: memref<1x160xf32, #tpu.memory_space<vmem>>, %arg8: memref<2x5x10xbf16, #tpu.memory_space<vmem>>, %arg9: memref<2x160x80xbf16, #tpu.memory_space<vmem>>, %arg10: memref<400x120xbf16, #tpu.memory_space<vmem>>, %arg11: memref<1x120xf32, #tpu.memory_space<vmem>>, %arg12: memref<120x84xbf16, #tpu.memory_space<vmem>>, %arg13: memref<1x84xf32, #tpu.memory_space<vmem>>, %arg14: memref<84x10xbf16, #tpu.memory_space<vmem>>, %arg15: memref<1x10xf32, #tpu.memory_space<vmem>>, %arg16: memref<1x1x10xf32, #tpu.memory_space<vmem>>) attributes {dimension_semantics = [#tpu.dimension_semantics<parallel>], iteration_bounds = array<i64: 2>, scalar_prefetch = 0 : i64, scratch_operands = 0 : i64, tpu.core_type = #tpu.core_type<tc>, window_params = [{transform_indices = @transform_0, window_bounds = array<i64: 1, 32, 96>}, {pipeline_mode = #tpu.pipeline_mode<synchronous>, transform_indices = @transform_1, window_bounds = array<i64: 480, 168>}, {pipeline_mode = #tpu.pipeline_mode<synchronous>, transform_indices = @transform_2, window_bounds = array<i64: 1, 168>}, {pipeline_mode = #tpu.pipeline_mode<synchronous>, transform_indices = @transform_3, window_bounds = array<i64: 2, 14, 28>}, {pipeline_mode = #tpu.pipeline_mode<synchronous>, transform_indices = @transform_4, window_bounds = array<i64: 2, 168, 84>}, {pipeline_mode = #tpu.pipeline_mode<synchronous>, transform_indices = @transform_5, window_bounds = array<i64: 420, 160>}, {pipeline_mode = #tpu.pipeline_mode<synchronous>, transform_indices = @transform_6, window_bounds = array<i64: 1, 160>}, {pipeline_mode = #tpu.pipeline_mode<synchronous>, transform_indices = @transform_7, window_bounds = array<i64: 2, 5, 10>}, {pipeline_mode = #tpu.pipeline_mode<synchronous>, transform_indices = @transform_8, window_bounds = array<i64: 2, 160, 80>}, {pipeline_mode = #tpu.pipeline_mode<synchronous>, transform_indices = @transform_9, window_bounds = array<i64: 400, 120>}, {pipeline_mode = #tpu.pipeline_mode<synchronous>, transform_indices = @transform_10, window_bounds = array<i64: 1, 120>}, {pipeline_mode = #tpu.pipeline_mode<synchronous>, transform_indices = @transform_11, window_bounds = array<i64: 120, 84>}, {pipeline_mode = #tpu.pipeline_mode<synchronous>, transform_indices = @transform_12, window_bounds = array<i64: 1, 84>}, {pipeline_mode = #tpu.pipeline_mode<synchronous>, transform_indices = @transform_13, window_bounds = array<i64: 84, 10>}, {pipeline_mode = #tpu.pipeline_mode<synchronous>, transform_indices = @transform_14, window_bounds = array<i64: 1, 10>}, {transform_indices = @transform_15, window_bounds = array<i64: 1, 1, 10>}]} {
    %c0 = arith.constant 0 : index
    %c0_0 = arith.constant 0 : index
    %c0_1 = arith.constant 0 : index
    %0 = vector.load %arg1[%c0, %c0_0, %c0_1] : memref<1x32x96xbf16, #tpu.memory_space<vmem>>, vector<1x32x96xbf16>
    %1 = vector.shape_cast %0 : vector<1x32x96xbf16> to vector<32x96xbf16>
    %2 = vector.extract_strided_slice %1 {offsets = [0, 0], sizes = [28, 96], strides = [1, 1]} : vector<32x96xbf16> to vector<28x96xbf16>
    %3 = vector.extract_strided_slice %1 {offsets = [1, 0], sizes = [28, 96], strides = [1, 1]} : vector<32x96xbf16> to vector<28x96xbf16>
    %4 = vector.extract_strided_slice %1 {offsets = [2, 0], sizes = [28, 96], strides = [1, 1]} : vector<32x96xbf16> to vector<28x96xbf16>
    %5 = vector.extract_strided_slice %1 {offsets = [3, 0], sizes = [28, 96], strides = [1, 1]} : vector<32x96xbf16> to vector<28x96xbf16>
    %6 = vector.extract_strided_slice %1 {offsets = [4, 0], sizes = [28, 96], strides = [1, 1]} : vector<32x96xbf16> to vector<28x96xbf16>
    %7 = tpu.concatenate %2, %3, %4, %5, %6 in 1 : vector<28x96xbf16>, vector<28x96xbf16>, vector<28x96xbf16>, vector<28x96xbf16>, vector<28x96xbf16> -> vector<28x480xbf16>
    %c0_2 = arith.constant 0 : index
    %c0_3 = arith.constant 0 : index
    %8 = vector.load %arg2[%c0_2, %c0_3] : memref<480x168xbf16, #tpu.memory_space<vmem>>, vector<480x168xbf16>
    %cst = arith.constant dense<0.000000e+00> : vector<28x168xf32>
    %9 = tpu.matmul %7, %8, %cst {dimension_numbers = #tpu.dot_dimension_numbers<[1], [0], [0], [1], [0, 0, 1, 1], [], []>} : vector<28x480xbf16>, vector<480x168xbf16>, vector<28x168xf32> -> vector<28x168xf32>
    %c0_4 = arith.constant 0 : index
    %c0_5 = arith.constant 0 : index
    %10 = vector.load %arg3[%c0_4, %c0_5] : memref<1x168xf32, #tpu.memory_space<vmem>>, vector<1x168xf32>
    %11 = vector.broadcast %10 : vector<1x168xf32> to vector<28x168xf32>
    %12 = arith.addf %9, %11 : vector<28x168xf32>
    %cst_6 = arith.constant 0.000000e+00 : f32
    %13 = vector.broadcast %cst_6 : f32 to vector<28x168xf32>
    %14 = arith.maximumf %12, %13 : vector<28x168xf32>
    %15 = arith.truncf %14 : vector<28x168xf32> to vector<28x168xbf16>
    %c0_7 = arith.constant 0 : index
    %c0_8 = arith.constant 0 : index
    %c0_9 = arith.constant 0 : index
    %16 = vector.load %arg4[%c0_7, %c0_8, %c0_9] : memref<2x14x28xbf16, #tpu.memory_space<vmem>>, vector<1x14x28xbf16>
    %17 = vector.shape_cast %16 : vector<1x14x28xbf16> to vector<14x28xbf16>
    %cst_10 = arith.constant dense<0.000000e+00> : vector<14x168xf32>
    %18 = tpu.matmul %17, %15, %cst_10 {dimension_numbers = #tpu.dot_dimension_numbers<[1], [0], [0], [1], [0, 0, 1, 1], [], []>} : vector<14x28xbf16>, vector<28x168xbf16>, vector<14x168xf32> -> vector<14x168xf32>
    %c1 = arith.constant 1 : index
    %c0_11 = arith.constant 0 : index
    %c0_12 = arith.constant 0 : index
    %19 = vector.load %arg4[%c1, %c0_11, %c0_12] : memref<2x14x28xbf16, #tpu.memory_space<vmem>>, vector<1x14x28xbf16>
    %20 = vector.shape_cast %19 : vector<1x14x28xbf16> to vector<14x28xbf16>
    %cst_13 = arith.constant dense<0.000000e+00> : vector<14x168xf32>
    %21 = tpu.matmul %20, %15, %cst_13 {dimension_numbers = #tpu.dot_dimension_numbers<[1], [0], [0], [1], [0, 0, 1, 1], [], []>} : vector<14x28xbf16>, vector<28x168xbf16>, vector<14x168xf32> -> vector<14x168xf32>
    %22 = arith.maximumf %18, %21 : vector<14x168xf32>
    %23 = arith.truncf %22 : vector<14x168xf32> to vector<14x168xbf16>
    %c0_14 = arith.constant 0 : index
    %c0_15 = arith.constant 0 : index
    %c0_16 = arith.constant 0 : index
    %24 = vector.load %arg5[%c0_14, %c0_15, %c0_16] : memref<2x168x84xbf16, #tpu.memory_space<vmem>>, vector<1x168x84xbf16>
    %25 = vector.shape_cast %24 : vector<1x168x84xbf16> to vector<168x84xbf16>
    %cst_17 = arith.constant dense<0.000000e+00> : vector<14x84xf32>
    %26 = tpu.matmul %23, %25, %cst_17 {dimension_numbers = #tpu.dot_dimension_numbers<[1], [0], [0], [1], [0, 0, 1, 1], [], []>} : vector<14x168xbf16>, vector<168x84xbf16>, vector<14x84xf32> -> vector<14x84xf32>
    %c1_18 = arith.constant 1 : index
    %c0_19 = arith.constant 0 : index
    %c0_20 = arith.constant 0 : index
    %27 = vector.load %arg5[%c1_18, %c0_19, %c0_20] : memref<2x168x84xbf16, #tpu.memory_space<vmem>>, vector<1x168x84xbf16>
    %28 = vector.shape_cast %27 : vector<1x168x84xbf16> to vector<168x84xbf16>
    %cst_21 = arith.constant dense<0.000000e+00> : vector<14x84xf32>
    %29 = tpu.matmul %23, %28, %cst_21 {dimension_numbers = #tpu.dot_dimension_numbers<[1], [0], [0], [1], [0, 0, 1, 1], [], []>} : vector<14x168xbf16>, vector<168x84xbf16>, vector<14x84xf32> -> vector<14x84xf32>
    %30 = arith.maximumf %26, %29 : vector<14x84xf32>
    %31 = arith.truncf %30 : vector<14x84xf32> to vector<14x84xbf16>
    %32 = vector.extract_strided_slice %31 {offsets = [0, 0], sizes = [10, 84], strides = [1, 1]} : vector<14x84xbf16> to vector<10x84xbf16>
    %33 = vector.extract_strided_slice %31 {offsets = [1, 0], sizes = [10, 84], strides = [1, 1]} : vector<14x84xbf16> to vector<10x84xbf16>
    %34 = vector.extract_strided_slice %31 {offsets = [2, 0], sizes = [10, 84], strides = [1, 1]} : vector<14x84xbf16> to vector<10x84xbf16>
    %35 = vector.extract_strided_slice %31 {offsets = [3, 0], sizes = [10, 84], strides = [1, 1]} : vector<14x84xbf16> to vector<10x84xbf16>
    %36 = vector.extract_strided_slice %31 {offsets = [4, 0], sizes = [10, 84], strides = [1, 1]} : vector<14x84xbf16> to vector<10x84xbf16>
    %37 = tpu.concatenate %32, %33, %34, %35, %36 in 1 : vector<10x84xbf16>, vector<10x84xbf16>, vector<10x84xbf16>, vector<10x84xbf16>, vector<10x84xbf16> -> vector<10x420xbf16>
    %c0_22 = arith.constant 0 : index
    %c0_23 = arith.constant 0 : index
    %38 = vector.load %arg6[%c0_22, %c0_23] : memref<420x160xbf16, #tpu.memory_space<vmem>>, vector<420x160xbf16>
    %cst_24 = arith.constant dense<0.000000e+00> : vector<10x160xf32>
    %39 = tpu.matmul %37, %38, %cst_24 {dimension_numbers = #tpu.dot_dimension_numbers<[1], [0], [0], [1], [0, 0, 1, 1], [], []>} : vector<10x420xbf16>, vector<420x160xbf16>, vector<10x160xf32> -> vector<10x160xf32>
    %c0_25 = arith.constant 0 : index
    %c0_26 = arith.constant 0 : index
    %40 = vector.load %arg7[%c0_25, %c0_26] : memref<1x160xf32, #tpu.memory_space<vmem>>, vector<1x160xf32>
    %41 = vector.broadcast %40 : vector<1x160xf32> to vector<10x160xf32>
    %42 = arith.addf %39, %41 : vector<10x160xf32>
    %cst_27 = arith.constant 0.000000e+00 : f32
    %43 = vector.broadcast %cst_27 : f32 to vector<10x160xf32>
    %44 = arith.maximumf %42, %43 : vector<10x160xf32>
    %45 = arith.truncf %44 : vector<10x160xf32> to vector<10x160xbf16>
    %c0_28 = arith.constant 0 : index
    %c0_29 = arith.constant 0 : index
    %c0_30 = arith.constant 0 : index
    %46 = vector.load %arg8[%c0_28, %c0_29, %c0_30] : memref<2x5x10xbf16, #tpu.memory_space<vmem>>, vector<1x5x10xbf16>
    %47 = vector.shape_cast %46 : vector<1x5x10xbf16> to vector<5x10xbf16>
    %cst_31 = arith.constant dense<0.000000e+00> : vector<5x160xf32>
    %48 = tpu.matmul %47, %45, %cst_31 {dimension_numbers = #tpu.dot_dimension_numbers<[1], [0], [0], [1], [0, 0, 1, 1], [], []>} : vector<5x10xbf16>, vector<10x160xbf16>, vector<5x160xf32> -> vector<5x160xf32>
    %c1_32 = arith.constant 1 : index
    %c0_33 = arith.constant 0 : index
    %c0_34 = arith.constant 0 : index
    %49 = vector.load %arg8[%c1_32, %c0_33, %c0_34] : memref<2x5x10xbf16, #tpu.memory_space<vmem>>, vector<1x5x10xbf16>
    %50 = vector.shape_cast %49 : vector<1x5x10xbf16> to vector<5x10xbf16>
    %cst_35 = arith.constant dense<0.000000e+00> : vector<5x160xf32>
    %51 = tpu.matmul %50, %45, %cst_35 {dimension_numbers = #tpu.dot_dimension_numbers<[1], [0], [0], [1], [0, 0, 1, 1], [], []>} : vector<5x10xbf16>, vector<10x160xbf16>, vector<5x160xf32> -> vector<5x160xf32>
    %52 = arith.maximumf %48, %51 : vector<5x160xf32>
    %53 = arith.truncf %52 : vector<5x160xf32> to vector<5x160xbf16>
    %c0_36 = arith.constant 0 : index
    %c0_37 = arith.constant 0 : index
    %c0_38 = arith.constant 0 : index
    %54 = vector.load %arg9[%c0_36, %c0_37, %c0_38] : memref<2x160x80xbf16, #tpu.memory_space<vmem>>, vector<1x160x80xbf16>
    %55 = vector.shape_cast %54 : vector<1x160x80xbf16> to vector<160x80xbf16>
    %cst_39 = arith.constant dense<0.000000e+00> : vector<5x80xf32>
    %56 = tpu.matmul %53, %55, %cst_39 {dimension_numbers = #tpu.dot_dimension_numbers<[1], [0], [0], [1], [0, 0, 1, 1], [], []>} : vector<5x160xbf16>, vector<160x80xbf16>, vector<5x80xf32> -> vector<5x80xf32>
    %c1_40 = arith.constant 1 : index
    %c0_41 = arith.constant 0 : index
    %c0_42 = arith.constant 0 : index
    %57 = vector.load %arg9[%c1_40, %c0_41, %c0_42] : memref<2x160x80xbf16, #tpu.memory_space<vmem>>, vector<1x160x80xbf16>
    %58 = vector.shape_cast %57 : vector<1x160x80xbf16> to vector<160x80xbf16>
    %cst_43 = arith.constant dense<0.000000e+00> : vector<5x80xf32>
    %59 = tpu.matmul %53, %58, %cst_43 {dimension_numbers = #tpu.dot_dimension_numbers<[1], [0], [0], [1], [0, 0, 1, 1], [], []>} : vector<5x160xbf16>, vector<160x80xbf16>, vector<5x80xf32> -> vector<5x80xf32>
    %60 = arith.maximumf %56, %59 : vector<5x80xf32>
    %61 = arith.truncf %60 : vector<5x80xf32> to vector<5x80xbf16>
    %62 = vector.extract_strided_slice %61 {offsets = [0, 0], sizes = [1, 80], strides = [1, 1]} : vector<5x80xbf16> to vector<1x80xbf16>
    %63 = vector.extract_strided_slice %61 {offsets = [1, 0], sizes = [1, 80], strides = [1, 1]} : vector<5x80xbf16> to vector<1x80xbf16>
    %64 = vector.extract_strided_slice %61 {offsets = [2, 0], sizes = [1, 80], strides = [1, 1]} : vector<5x80xbf16> to vector<1x80xbf16>
    %65 = vector.extract_strided_slice %61 {offsets = [3, 0], sizes = [1, 80], strides = [1, 1]} : vector<5x80xbf16> to vector<1x80xbf16>
    %66 = vector.extract_strided_slice %61 {offsets = [4, 0], sizes = [1, 80], strides = [1, 1]} : vector<5x80xbf16> to vector<1x80xbf16>
    %67 = tpu.concatenate %62, %63, %64, %65, %66 in 1 : vector<1x80xbf16>, vector<1x80xbf16>, vector<1x80xbf16>, vector<1x80xbf16>, vector<1x80xbf16> -> vector<1x400xbf16>
    %c0_44 = arith.constant 0 : index
    %c0_45 = arith.constant 0 : index
    %68 = vector.load %arg10[%c0_44, %c0_45] : memref<400x120xbf16, #tpu.memory_space<vmem>>, vector<400x120xbf16>
    %cst_46 = arith.constant dense<0.000000e+00> : vector<1x120xf32>
    %69 = tpu.matmul %67, %68, %cst_46 {dimension_numbers = #tpu.dot_dimension_numbers<[1], [0], [0], [1], [0, 0, 1, 1], [], []>} : vector<1x400xbf16>, vector<400x120xbf16>, vector<1x120xf32> -> vector<1x120xf32>
    %c0_47 = arith.constant 0 : index
    %c0_48 = arith.constant 0 : index
    %70 = vector.load %arg11[%c0_47, %c0_48] : memref<1x120xf32, #tpu.memory_space<vmem>>, vector<1x120xf32>
    %71 = arith.addf %69, %70 : vector<1x120xf32>
    %cst_49 = arith.constant 0.000000e+00 : f32
    %72 = vector.broadcast %cst_49 : f32 to vector<1x120xf32>
    %73 = arith.maximumf %71, %72 : vector<1x120xf32>
    %74 = arith.truncf %73 : vector<1x120xf32> to vector<1x120xbf16>
    %c0_50 = arith.constant 0 : index
    %c0_51 = arith.constant 0 : index
    %75 = vector.load %arg12[%c0_50, %c0_51] : memref<120x84xbf16, #tpu.memory_space<vmem>>, vector<120x84xbf16>
    %cst_52 = arith.constant dense<0.000000e+00> : vector<1x84xf32>
    %76 = tpu.matmul %74, %75, %cst_52 {dimension_numbers = #tpu.dot_dimension_numbers<[1], [0], [0], [1], [0, 0, 1, 1], [], []>} : vector<1x120xbf16>, vector<120x84xbf16>, vector<1x84xf32> -> vector<1x84xf32>
    %c0_53 = arith.constant 0 : index
    %c0_54 = arith.constant 0 : index
    %77 = vector.load %arg13[%c0_53, %c0_54] : memref<1x84xf32, #tpu.memory_space<vmem>>, vector<1x84xf32>
    %78 = arith.addf %76, %77 : vector<1x84xf32>
    %cst_55 = arith.constant 0.000000e+00 : f32
    %79 = vector.broadcast %cst_55 : f32 to vector<1x84xf32>
    %80 = arith.maximumf %78, %79 : vector<1x84xf32>
    %81 = arith.truncf %80 : vector<1x84xf32> to vector<1x84xbf16>
    %c0_56 = arith.constant 0 : index
    %c0_57 = arith.constant 0 : index
    %82 = vector.load %arg14[%c0_56, %c0_57] : memref<84x10xbf16, #tpu.memory_space<vmem>>, vector<84x10xbf16>
    %cst_58 = arith.constant dense<0.000000e+00> : vector<1x10xf32>
    %83 = tpu.matmul %81, %82, %cst_58 {dimension_numbers = #tpu.dot_dimension_numbers<[1], [0], [0], [1], [0, 0, 1, 1], [], []>} : vector<1x84xbf16>, vector<84x10xbf16>, vector<1x10xf32> -> vector<1x10xf32>
    %c0_59 = arith.constant 0 : index
    %c0_60 = arith.constant 0 : index
    %84 = vector.load %arg15[%c0_59, %c0_60] : memref<1x10xf32, #tpu.memory_space<vmem>>, vector<1x10xf32>
    %85 = arith.addf %83, %84 : vector<1x10xf32>
    %c0_61 = arith.constant 0 : index
    %c0_62 = arith.constant 0 : index
    %c0_63 = arith.constant 0 : index
    %86 = vector.load %arg16[%c0_61, %c0_62, %c0_63] : memref<1x1x10xf32, #tpu.memory_space<vmem>>, vector<1x1x10xf32>
    %87 = vector.shape_cast %86 : vector<1x1x10xf32> to vector<1x10xf32>
    %88 = vector.shape_cast %85 : vector<1x10xf32> to vector<1x1x10xf32>
    tpu.vector_store %arg16[%c0_61, %c0_62, %c0_63], %88 {strides = array<i32>} : memref<1x1x10xf32, #tpu.memory_space<vmem>>, vector<1x1x10xf32>,
    return
  }
  func.func @transform_0(%arg0: i32) -> (i32, i32, i32) {
    %c0_i32 = arith.constant 0 : i32
    %c0_i32_0 = arith.constant 0 : i32
    %c0_i32_1 = arith.constant 0 : i32
    return %arg0, %c0_i32, %c0_i32_0 : i32, i32, i32
  }
  func.func @transform_1(%arg0: i32) -> (i32, i32) {
    %c0_i32 = arith.constant 0 : i32
    %c0_i32_0 = arith.constant 0 : i32
    %c0_i32_1 = arith.constant 0 : i32
    return %c0_i32, %c0_i32_0 : i32, i32
  }
  func.func @transform_2(%arg0: i32) -> (i32, i32) {
    %c0_i32 = arith.constant 0 : i32
    %c0_i32_0 = arith.constant 0 : i32
    %c0_i32_1 = arith.constant 0 : i32
    return %c0_i32, %c0_i32_0 : i32, i32
  }
  func.func @transform_3(%arg0: i32) -> (i32, i32, i32) {
    %c0_i32 = arith.constant 0 : i32
    %c0_i32_0 = arith.constant 0 : i32
    %c0_i32_1 = arith.constant 0 : i32
    %c0_i32_2 = arith.constant 0 : i32
    return %c0_i32, %c0_i32_0, %c0_i32_1 : i32, i32, i32
  }
  func.func @transform_4(%arg0: i32) -> (i32, i32, i32) {
    %c0_i32 = arith.constant 0 : i32
    %c0_i32_0 = arith.constant 0 : i32
    %c0_i32_1 = arith.constant 0 : i32
    %c0_i32_2 = arith.constant 0 : i32
    return %c0_i32, %c0_i32_0, %c0_i32_1 : i32, i32, i32
  }
  func.func @transform_5(%arg0: i32) -> (i32, i32) {
    %c0_i32 = arith.constant 0 : i32
    %c0_i32_0 = arith.constant 0 : i32
    %c0_i32_1 = arith.constant 0 : i32
    return %c0_i32, %c0_i32_0 : i32, i32
  }
  func.func @transform_6(%arg0: i32) -> (i32, i32) {
    %c0_i32 = arith.constant 0 : i32
    %c0_i32_0 = arith.constant 0 : i32
    %c0_i32_1 = arith.constant 0 : i32
    return %c0_i32, %c0_i32_0 : i32, i32
  }
  func.func @transform_7(%arg0: i32) -> (i32, i32, i32) {
    %c0_i32 = arith.constant 0 : i32
    %c0_i32_0 = arith.constant 0 : i32
    %c0_i32_1 = arith.constant 0 : i32
    %c0_i32_2 = arith.constant 0 : i32
    return %c0_i32, %c0_i32_0, %c0_i32_1 : i32, i32, i32
  }
  func.func @transform_8(%arg0: i32) -> (i32, i32, i32) {
    %c0_i32 = arith.constant 0 : i32
    %c0_i32_0 = arith.constant 0 : i32
    %c0_i32_1 = arith.constant 0 : i32
    %c0_i32_2 = arith.constant 0 : i32
    return %c0_i32, %c0_i32_0, %c0_i32_1 : i32, i32, i32
  }
  func.func @transform_9(%arg0: i32) -> (i32, i32) {
    %c0_i32 = arith.constant 0 : i32
    %c0_i32_0 = arith.constant 0 : i32
    %c0_i32_1 = arith.constant 0 : i32
    return %c0_i32, %c0_i32_0 : i32, i32
  }
  func.func @transform_10(%arg0: i32) -> (i32, i32) {
    %c0_i32 = arith.constant 0 : i32
    %c0_i32_0 = arith.constant 0 : i32
    %c0_i32_1 = arith.constant 0 : i32
    return %c0_i32, %c0_i32_0 : i32, i32
  }
  func.func @transform_11(%arg0: i32) -> (i32, i32) {
    %c0_i32 = arith.constant 0 : i32
    %c0_i32_0 = arith.constant 0 : i32
    %c0_i32_1 = arith.constant 0 : i32
    return %c0_i32, %c0_i32_0 : i32, i32
  }
  func.func @transform_12(%arg0: i32) -> (i32, i32) {
    %c0_i32 = arith.constant 0 : i32
    %c0_i32_0 = arith.constant 0 : i32
    %c0_i32_1 = arith.constant 0 : i32
    return %c0_i32, %c0_i32_0 : i32, i32
  }
  func.func @transform_13(%arg0: i32) -> (i32, i32) {
    %c0_i32 = arith.constant 0 : i32
    %c0_i32_0 = arith.constant 0 : i32
    %c0_i32_1 = arith.constant 0 : i32
    return %c0_i32, %c0_i32_0 : i32, i32
  }
  func.func @transform_14(%arg0: i32) -> (i32, i32) {
    %c0_i32 = arith.constant 0 : i32
    %c0_i32_0 = arith.constant 0 : i32
    %c0_i32_1 = arith.constant 0 : i32
    return %c0_i32, %c0_i32_0 : i32, i32
  }
  func.func @transform_15(%arg0: i32) -> (i32, i32, i32) {
    %c0_i32 = arith.constant 0 : i32
    %c0_i32_0 = arith.constant 0 : i32
    %c0_i32_1 = arith.constant 0 : i32
    return %arg0, %c0_i32, %c0_i32_0 : i32, i32, i32
  }
}

</mosaic_0001>

<bundles_post_ra>
// kernel: net_forward.1
= control target key start
LH: loop header
LB: loop body
LE: loop exit
PB: predicated region body
PF: predicated region fallthrough
CT: control target
= control target key end

     0   :  { %s4537_s0 = inlined_call_operand.vmem [shape: bf16[2,32,96], index: 0, kind: input, shape index: {}]   ;;  %s4538_s1 = inlined_call_operand.vmem [shape: bf16[480,168], index: 1, kind: input, shape index: {}]   ;;  %s4539_s2 = inlined_call_operand.vmem [shape: f32[1,168], index: 2, kind: input, shape index: {}]   ;;  %s4540_s3 = inlined_call_operand.vmem [shape: bf16[2,14,28], index: 3, kind: input, shape index: {}]   ;;  %s4541_s4 = inlined_call_operand.vmem [shape: bf16[2,168,84], index: 4, kind: input, shape index: {}]   ;;  %s4542_s5 = inlined_call_operand.vmem [shape: bf16[420,160], index: 5, kind: input, shape index: {}]   ;;  %s4543_s6 = inlined_call_operand.vmem [shape: f32[1,160], index: 6, kind: input, shape index: {}]   ;;  %s4544_s7 = inlined_call_operand.vmem [shape: bf16[2,5,10], index: 7, kind: input, shape index: {}]   ;;  %s4545_s8 = inlined_call_operand.vmem [shape: bf16[2,160,80], index: 8, kind: input, shape index: {}]   ;;  %s4546_s9 = inlined_call_operand.vmem [shape: bf16[400,120], index: 9, kind: input, shape index: {}]   ;;  %s4547_s10 = inlined_call_operand.vmem [shape: f32[1,120], index: 10, kind: input, shape index: {}]   ;;  %s4548_s11 = inlined_call_operand.vmem [shape: bf16[120,84], index: 11, kind: input, shape index: {}]   ;;  %s4549_s12 = inlined_call_operand.vmem [shape: f32[1,84], index: 12, kind: input, shape index: {}]   ;;  %s4550_s13 = inlined_call_operand.vmem [shape: bf16[84,10], index: 13, kind: input, shape index: {}]   ;;  %s4551_s14 = inlined_call_operand.vmem [shape: f32[1,10], index: 14, kind: input, shape index: {}]   ;;  %s4552_s15 = inlined_call_operand.hbm [shape: f32[2,1,10], index: 15, kind: output, shape index: {}]  }
   0x1   :  { %4560 = sst [smem:[#allocation11_spill]] %s4552_s15 }
   0x2   :  { %20 = vsyncpa [#allocation3], 0 }
   0x3   :  { %22 = vsyncpa [#allocation3 + $0x1], 0  ;;  %s3685_s18 = smov 0   ;;  %s3687_s19 = smov 0  }
   0x4   :  { %s3689_s20 = smov 0   ;;  %s3691_s21 = smov 0  }
   0x5 LB: > { %4561 = sst [smem:[#allocation5_spill]] %s3579_s18  ;;  %s3706_s22 = sadd.s32 4294967295, %s3591_s21   ;;  %s3591_s21 = sphi %s3691_s21, %s4573_s21   ;;  %s3587_s20 = sphi %s3689_s20, %s4575_s20   ;;  %s3583_s19 = sphi %s3687_s19, %s4577_s19   ;;  %s3579_s18 = sphi %s3685_s18, %s4576_s18  }
   0x6   : > { %4562 = sst [smem:[#allocation6_spill]] %s3587_s20  ;;  %s2854_s23 = sadd.s32 4294967294, %s3591_s21  }
   0x7   : > { %4563 = sst [smem:[#allocation7_spill]] %s3591_s21  ;;  %s3710_s24 = sadd.s32 1, %s3591_s21  }
   0x8   : > { %4564 = sst [smem:[#allocation8_spill]] %s3710_s24  ;;  %s355_s25 = sadd.s32 1, %s3587_s20 }
   0x9   : > { %s352_s26 = ssub.s32 %s3591_s21, %s3710_s24  ;;  %p365_p0 = scmp.ne.s32.totalorder %s3587_s20, %s3583_s19 }
   0xa   : > { %p353_p1 = scmp.eq.s32.totalorder %s352_s26, 0  ;;  %p366_p2 = scmp.eq.s32.totalorder %s3706_s22, 1 }
   0xb   : > { %p371_p3 = scmp.ne.s32.totalorder %s3583_s19, %s3579_s18  ;;  %p372_p4 = scmp.eq.s32.totalorder %s2854_s23, 1 }
   0xc   : > { %s3721_s27 = scalar_select %p353_p1, %s3587_s20, %s355_s25  }
   0xd   : > { %p3723_p5 = por %p366_p2, %p365_p0  ;;  %p3727_p6 = por %p372_p4, %p371_p3 }
   0xe   : > { %4565 = sst [smem:[#allocation9_spill]] %s3721_s27  ;;  %p2857_p7 = scmp.ge.s32.totalorder %s3591_s21, 1 }
   0xf   : > { %s4567_s29 = scalar_select %p3727_p6, 1, 0 }
  0x10   : > { %p440_p8 = scmp.lt.s32.totalorder %s3591_s21, 3 }
  0x11   : > { %4568 = sst [smem:[#allocation10_spill]] %s4567_s29 }
  0x12   : > { %p441_p9 = pnand %p2857_p7, %p440_p8 }
  0x13   : > { %p487_p10 = scmp.lt.s32.totalorder (!%p441_p9), %s3706_s22, 1  ;;  %v3276_v0 = vld [vmem:[%s4538_s1 + $0x4] ss:$8 sps:$4 sm:$0xff] (!%p441_p9)   ;;  %v3278_v1 = vld [vmem:[%s4538_s1] ss:$8 sps:$4 sm:$0xff] (!%p441_p9)   ;;  %vm527_vm1 = vcmask (!%p441_p9), 1046528  }
  0x14   : > { %444 = sbr.rel (%p441_p9) target bundleno = 2609 (0xa31), region = 80  ;;  %v3279_v2 = vld [vmem:[%s4538_s1 + $0x14] ss:$8 sps:$4 sm:$0xff] (!%p441_p9)   ;;  %950 = vmatprep.subr.bf16.mxu0 (!%p441_p9), %v3276_v0  ;;  %v3281_v3 = vld [vmem:[%s4538_s1 + $0x10] ss:$8 sps:$4 sm:$0xff] (!%p441_p9)   ;;  %s3593_s23 = smov (!%p441_p9), 96  }
  0x15   : > { %951 = vmatpush1.bf16.msra.mxu0 (!%p441_p9), %v3278_v1  ;;  %v3282_v4 = vld [vmem:[%s4538_s1 + $0x24] ss:$8 sps:$4 sm:$0xff] (!%p441_p9)   ;;  %v3284_v10 = vld [vmem:[%s4538_s1 + $0x20] ss:$8 sps:$4 sm:$0xff] (!%p441_p9)   ;;  %v3285_v12 = vld [vmem:[%s4538_s1 + $0x34] ss:$8 sps:$4 sm:$0xff] (!%p441_p9)  }
  0x16   : > { %952 = vmatprep.subr.bf16.mxu0 (!%p441_p9), %v3279_v2  ;;  %vm507_vm0 = vsmask.f32 (!%p441_p9), 7424  ;;  %v3287_v23 = vld [vmem:[%s4538_s1 + $0x30] ss:$8 sps:$4 sm:$0xff] (!%p441_p9)   ;;  %v3288_v24 = vld [vmem:[%s4538_s1 + $0x44] ss:$8 sps:$4 sm:$0xff] (!%p441_p9)  }
  0x17   : > { %v3290_v29 = vld [vmem:[%s4538_s1 + $0x40] ss:$8 sps:$4 sm:$0xff] (!%p441_p9)   ;;  %vm535_vm2 = vsmask.f32 (!%p441_p9), 6400  ;;  %v3291_v30 = vld [vmem:[%s4538_s1 + $0x54] ss:$8 sps:$4 sm:$0xff] (!%p441_p9)  }
  0x18   : > { %s3594_s24 = smov (!%p441_p9), 64   ;;  %v3293_v32 = vld [vmem:[%s4538_s1 + $0x50] ss:$8 sps:$4 sm:$0xff] (!%p441_p9)   ;;  %v3294_v33 = vld [vmem:[%s4538_s1 + $0x64] ss:$8 sps:$4 sm:$0xff] (!%p441_p9)   ;;  %s3595_s27 = smov (!%p441_p9), 32  }
  0x19   : > { %953 = vmatpush1.bf16.msra.mxu0 (!%p441_p9), %v3281_v3  ;;  %v3296_v34 = vld [vmem:[%s4538_s1 + $0x60] ss:$8 sps:$4 sm:$0xff] (!%p441_p9)   ;;  %v3297_v35 = vld [vmem:[%s4538_s1 + $0x74] ss:$8 sps:$4 sm:$0xff] (!%p441_p9)   ;;  %v3299_v36 = vld [vmem:[%s4538_s1 + $0x70] ss:$8 sps:$4 sm:$0xff] (!%p441_p9)  }
  0x1a   : > { %954 = vmatprep.subr.bf16.mxu0 (!%p441_p9), %v3282_v4  ;;  %v3300_v37 = vld [vmem:[%s4538_s1 + $0x84] ss:$8 sps:$4 sm:$0xff] (!%p441_p9)   ;;  %v3302_v38 = vld [vmem:[%s4538_s1 + $0x80] ss:$8 sps:$4 sm:$0xff] (!%p441_p9)   ;;  %v3303_v39 = vld [vmem:[%s4538_s1 + $0x94] ss:$8 sps:$4 sm:$0xff] (!%p441_p9)  }
  0x1b   : > { %s488_s30 = scalar_select %p487_p10, %s3706_s22, 1  ;;  %v3305_v40 = vld [vmem:[%s4538_s1 + $0x90] ss:$8 sps:$4 sm:$0xff]   ;;  %v3306_v41 = vld [vmem:[%s4538_s1 + $0xa4] ss:$8 sps:$4 sm:$0xff]   ;;  %vm558_vm3 = vcmask 523264  }
  0x1c   : > { %v3308_v42 = vld [vmem:[%s4538_s1 + $0xa0] ss:$8 sps:$4 sm:$0xff]   ;;  %v3309_v43 = vld [vmem:[%s4538_s1 + $0xb4] ss:$8 sps:$4 sm:$0xff]   ;;  %v3311_v44 = vld [vmem:[%s4538_s1 + $0xb0] ss:$8 sps:$4 sm:$0xff]  }
  0x1d   : > { %s3125_s20 = sshll.u32 %s488_s30, 4  ;;  %955 = vmatpush1.bf16.msra.mxu0 %v3284_v10  ;;  %v3312_v45 = vld [vmem:[%s4538_s1 + $0xc4] ss:$8 sps:$4 sm:$0xff]   ;;  %v3314_v46 = vld [vmem:[%s4538_s1 + $0xc0] ss:$8 sps:$4 sm:$0xff]   ;;  %vm551_vm4 = vcmask 785408  }
  0x1e   : > { %s491_s15 = scalar_lea.vmem %s4537_s0, %s3125_s20  ;;  %956 = vmatprep.subr.bf16.mxu0 %v3285_v12  ;;  %v3315_v47 = vld [vmem:[%s4538_s1 + $0xd4] ss:$8 sps:$4 sm:$0xff]   ;;  %v3317_v48 = vld [vmem:[%s4538_s1 + $0xd0] ss:$8 sps:$4 sm:$0xff]   ;;  %v3318_v49 = vld [vmem:[%s4538_s1 + $0xe4] ss:$8 sps:$4 sm:$0xff]  }
  0x1f   : > { %v3753_v5 = vld [vmem:[%s491_s15] sm:$0xff]   ;;  %v3755_v6 = vld [vmem:[%s491_s15 + $0x8] sm:$0xff]   ;;  %v3321_v51 = vld [vmem:[%s4538_s1 + $0xf4] ss:$8 sps:$4 sm:$0xff]   ;;  %vm547_vm5 = vcmask 1045504   ;;  %vm565_vm6 = vcmask 261120  }
  0x20   : > { %v509_v7 = vshrl.u32 %v3753_v5, 16  ;;  %v511_v8 = vshll.u32 %v3753_v5, 16  ;;  %v516_v9 = vshll.u32 %v3755_v6, 16  ;;  %v520_v11 = vshrl.u32 %v3755_v6, 16  ;;  %v3320_v50 = vld [vmem:[%s4538_s1 + $0xe0] ss:$8 sps:$4 sm:$0xff]  }
  0x21   : > { %v528_v15 = vrot.slane %v3753_v5, 1  ;;  %v529_v16 = vrot.slane %v3755_v6, 1  ;;  %957 = vmatpush1.bf16.msra.mxu0 %v3287_v23  ;;  %v3323_v52 = vld [vmem:[%s4538_s1 + $0xf0] ss:$8 sps:$4 sm:$0xff]   ;;  %v3326_v53 = vld [vmem:[%s4538_s1 + $0x104] ss:$8 sps:$4 sm:$0xff]  }
  0x22   : > { %v513_v13 = vrot.slane %v511_v8, 1  ;;  %v518_v14 = vrot.slane %v516_v9, 1  ;;  %v536_v17 = vrot.slane %v509_v7, 1  ;;  %v537_v18 = vrot.slane %v511_v8, 2  ;;  %958 = vmatprep.subr.bf16.mxu0 %v3288_v24  ;;  %v3324_v58 = vld [vmem:[%s4538_s1 + $0x100] ss:$8 sps:$4 sm:$0xff]  }
  0x23   : > { %v539_v20 = vrot.slane %v520_v11, 1  ;;  %v540_v21 = vrot.slane %v516_v9, 2  ;;  %v530_v26 = vsel %vm527_vm1, %v528_v15, %v529_v16  ;;  %v3329_v60 = vld [vmem:[%s4538_s1 + $0x114] ss:$8 sps:$4 sm:$0xff]   ;;  %v3327_v63 = vld [vmem:[%s4538_s1 + $0x110] ss:$8 sps:$4 sm:$0xff]  }
  0x24   : > { %v514_v19 = vor.u32 %v513_v13, %v509_v7  ;;  %v522_v22 = vor.u32 %v520_v11, %v518_v14  ;;  %v538_v27 = vor.u32 %v537_v18, %v536_v17  ;;  %v3332_v0 = vld [vmem:[%s4538_s1 + $0x124] ss:$8 sps:$4 sm:$0xff]   ;;  %v548_v1 = vrot.slane %v3753_v5, 2  ;;  %v3330_v3 = vld [vmem:[%s4538_s1 + $0x120] ss:$8 sps:$4 sm:$0xff]   ;;  %s3597_s30 = smov 40  }
  0x25   : > { %v541_v28 = vor.u32 %v540_v21, %v539_v20  ;;  %959 = vmatpush1.bf16.msra.mxu0 %v3290_v29  ;;  %v549_v2 = vrot.slane %v3755_v6, 2  ;;  %v3335_v7 = vld [vmem:[%s4538_s1 + $0x134] ss:$8 sps:$4 sm:$0xff]   ;;  %v3336_v9 = vld [vmem:[%s4538_s1 + $0x140] ss:$8 sps:$4 sm:$0xff]   ;;  %vm1075_vm7 = vcmask 228352  }
  0x26   : > { %v519_v25 = vsel %vm507_vm0, %v514_v19, %v518_v14  ;;  %525 = vrot.lane.b32.xlu1 %v522_v22, %s3593_s23  ;;  %960 = vmatprep.subr.bf16.mxu0 %v3291_v30  ;;  %v3341_v10 = vld [vmem:[%s4538_s1 + $0x154] ss:$8 sps:$4 sm:$0xff]   ;;  %v3339_v11 = vld [vmem:[%s4538_s1 + $0x150] ss:$8 sps:$4 sm:$0xff]   ;;  %v3344_v12 = vld [vmem:[%s4538_s1 + $0x164] ss:$8 sps:$4 sm:$0xff]  }
  0x27   : > { %523 = vrot.lane.b32.xlu0 %v519_v25, %s3593_s23  ;;  %v542_v31 = vsel %vm535_vm2, %v538_v27, %v541_v28  ;;  %v550_v8 = vsel %vm547_vm5, %v548_v1, %v549_v2  ;;  %v3342_v13 = vld [vmem:[%s4538_s1 + $0x160] ss:$8 sps:$4 sm:$0xff]   ;;  %v3347_v14 = vld [vmem:[%s4538_s1 + $0x174] ss:$8 sps:$4 sm:$0xff]   ;;  %v3345_v15 = vld [vmem:[%s4538_s1 + $0x170] ss:$8 sps:$4 sm:$0xff]  }
  0x28   : > { %v3348_v17 = vld [vmem:[%s4538_s1 + $0x180] ss:$8 sps:$4 sm:$0xff]   ;;  %v3353_v18 = vld [vmem:[%s4538_s1 + $0x194] ss:$8 sps:$4 sm:$0xff]   ;;  %v3351_v19 = vld [vmem:[%s4538_s1 + $0x190] ss:$8 sps:$4 sm:$0xff]  }
  0x29   : > { %961 = vmatpush1.bf16.msra.mxu0 %v3293_v32  ;;  %v3356_v20 = vld [vmem:[%s4538_s1 + $0x1a4] ss:$8 sps:$4 sm:$0xff]   ;;  %v3354_v21 = vld [vmem:[%s4538_s1 + $0x1a0] ss:$8 sps:$4 sm:$0xff]   ;;  %v3359_v22 = vld [vmem:[%s4538_s1 + $0x1b4] ss:$8 sps:$4 sm:$0xff]  }
  0x2a   : > { %533 = vrot.lane.b32.xlu1 %v529_v16, %s3594_s24  ;;  %962 = vmatprep.subr.bf16.mxu0 %v3294_v33  ;;  %v3350_v16 = vld [vmem:[%s4538_s1 + $0x184] ss:$8 sps:$4 sm:$0xff]   ;;  %v3357_v23 = vld [vmem:[%s4538_s1 + $0x1b0] ss:$8 sps:$4 sm:$0xff]   ;;  %v3360_v25 = vld [vmem:[%s4538_s1 + $0x1c0] ss:$8 sps:$4 sm:$0xff]   ;;  %v634_v33 = vlaneseq }
  0x2b   : > { %531 = vrot.lane.b32.xlu0 %v530_v26, %s3594_s24  ;;  %v3362_v24 = vld [vmem:[%s4538_s1 + $0x1c4] ss:$8 sps:$4 sm:$0xff]   ;;  %v3365_v26 = vld [vmem:[%s4538_s1 + $0x1d4] ss:$8 sps:$4 sm:$0xff]   ;;  %v3363_v27 = vld [vmem:[%s4538_s1 + $0x1d0] ss:$8 sps:$4 sm:$0xff]  }
  0x2c   : > { %v3596_v32 = vmov 0   ;;  %vm1277_vm8 = vcmask 1043456   ;;  %vm1273_vm9 = vcmask 326656   ;;  %s3598_s23 = smov 80   ;;  %s3599_s25 = smov 84   ;;  %vm1481_vm10 = vcmask 1014784  }
  0x2d   : > { %963 = vmatpush1.bf16.msra.mxu0 %v3296_v34  ;;  %1118 = vmatprep.mubr.bf16.mxu1 %v3596_v32  ;;  %v3956_v34 = vshrl.u32 %v634_v33, 7  ;;  %s3600_s26 = smov 124   ;;  %vm1475_vm11 = vcmask 687104   ;;  %vm1819_vm12 = vcmask 293888   ;;  %vm1822_vm13 = vcmask 1041408   ;;  %s3602_s29 = smov 112  }
  0x2e   : > { %545 = vrot.lane.b32.xlu1 %v541_v28, %s3595_s27  ;;  %964 = vmatprep.subr.bf16.mxu0 %v3297_v35  ;;  %vm1485_vm14 = vcmask 654336   ;;  %vm1926_vm15 = vcmask 1044480   ;;  %vm1922_vm0 = vcmask 80896   ;;  %vm2498_vm1 = vcmask 130048   ;;  %s485_s16 = sand.u32 1, %s3583_s19   ;;  %s3122_s20 = sshll.u32 %s3706_s22, 4 }
  0x2f   : > { %543 = vrot.lane.b32.xlu0 %v542_v31, %s3595_s27  ;;  %v636_v35 = vsub.s32 0, %v3956_v34  ;;  %vm2290_vm2 = vcmask 916480   ;;  %s486_s21 = scalar_lea.vmem [#allocation2], %s485_s16  ;;  %s2787_s22 = scalar_lea.sflag [#allocation3], %s485_s16 }
  0x30   : > { %s2799_s15 = sshll.u32 %s486_s21, 4  ;;  %s4497_s15 = int_to_ptr.vmem [resolvable:$true] %s2799_s15 }
  0x31   : > { %965 = vmatpush1.bf16.msra.mxu0 %v3299_v36  ;;  %v632_v36 = vld [vmem:[%s4539_s2] sm:$0x3] }
  0x32   : > { %966 = vmatprep.subr.bf16.mxu0 %v3300_v37  ;;  %v640_v37 = vsub.s32 1, %v3956_v34  ;;  %v1921_v34 = vld [vmem:[%s4544_s7] sm:$0x7] }
  0x35   : > { %967 = vmatpush1.bf16.msra.mxu0 %v3302_v38  ;;  %v637_v38 = vrot.slane %v632_v36, %v636_v35 }
  0x36   : > { %968 = vmatprep.subr.bf16.mxu0 %v3303_v39  ;;  %v641_v39 = vrot.slane %v632_v36, %v640_v37  ;;  %v3379_v36 = vld [vmem:[%s4541_s4 + $0x54] sm:$0xff]  }
  0x39   : > { %969 = vmatpush1.bf16.msra.mxu0 %v3305_v40 }
  0x3a   : > { %970 = vmatprep.subr.bf16.mxu0 %v3306_v41 }
  0x3d   : > { %971 = vmatpush1.bf16.msra.mxu0 %v3308_v42 }
  0x3e   : > { %972 = vmatprep.subr.bf16.mxu0 %v3309_v43 }
  0x41   : > { %973 = vmatpush1.bf16.msra.mxu0 %v3311_v44 }
  0x42   : > { %974 = vmatprep.subr.bf16.mxu0 %v3312_v45 }
  0x45   : > { %975 = vmatpush1.bf16.msra.mxu0 %v3314_v46 }
  0x46   : > { %976 = vmatprep.subr.bf16.mxu0 %v3315_v47 }
  0x49   : > { %977 = vmatpush1.bf16.msra.mxu0 %v3317_v48 }
  0x4a   : > { %978 = vmatprep.subr.bf16.mxu0 %v3318_v49 }
  0x4d   : > { %979 = vmatpush1.bf16.msra.mxu0 %v3320_v50 }
  0x4e   : > { %980 = vmatprep.subr.bf16.mxu0 %v3321_v51 }
  0x51   : > { %981 = vmatpush1.bf16.msra.mxu0 %v3323_v52 }
  0x52   : > { %1003 = vmatprep.subr.bf16.mxu0 %v3326_v53 }
  0x98   : > { %v526_v54 = vpop.permute.xlu1 %525 }
  0x99   : > { %v524_v55 = vpop.permute.xlu0 %523  ;;  %v556_v4 = vsel %vm551_vm4, %v3755_v6, %v526_v54  ;;  %v3338_v6 = vld [vmem:[%s4538_s1 + $0x144] ss:$8 sps:$4 sm:$0xff]  }
  0x9a   : > { %v553_v62 = vsel %vm551_vm4, %v3753_v5, %v524_v55  ;;  %v3333_v5 = vld [vmem:[%s4538_s1 + $0x130] ss:$8 sps:$4 sm:$0xff]  }
  0x9c   : > { %v3852_v56 = vpop.permute.xlu1 %533 }
  0x9d   : > { %v3854_v57 = vpop.permute.xlu0 %531  ;;  %v563_v61 = vsel %vm558_vm3, %v526_v54, %v3852_v56 }
  0x9e   : > { %v560_v59 = vsel %vm558_vm3, %v524_v55, %v3854_v57 }
  0x9f   : > { %982 = vmatprep.mubr.bf16.mxu0 %v560_v59 }
  0xa0   : > { %983 = vmatmul.mubr.bf16.vlgmr.msra.gmra.mrb[0].mxu0 %v553_v62  ;;  %v546_v30 = vpop.permute.xlu1 %545 }
  0xa1   : > { %1004 = vmatpush1.bf16.msra.mxu0 %v3324_v58  ;;  %992 = vmatprep.mubr.bf16.mxu0 %v563_v61  ;;  %v544_v28 = vpop.permute.xlu0 %543  ;;  %v570_v31 = vsel %vm565_vm6, %v3852_v56, %v546_v30 }
  0xa2   : > { %1005 = vmatprep.subr.bf16.mxu0 %v3329_v60  ;;  %v567_v29 = vsel %vm565_vm6, %v3854_v57, %v544_v28 }
  0xa5   : > { %1006 = vmatpush1.bf16.msra.mxu0 %v3327_v63 }
  0xa6   : > { %1007 = vmatprep.subr.bf16.mxu0 %v3332_v0 }
  0xa8   : > { %993 = vmatmul.mubr.bf16.gmra.mrb[4].mxu0 %v556_v4 }
  0xa9   : > { %1008 = vmatpush1.bf16.msra.mxu0 %v3330_v3  ;;  %2922 = vmatprep.mubr.msk.bf16.mxu0 %vm551_vm4, %v550_v8  ;;  %v3367_v8 = vld [vmem:[%s4540_s3 + $0x8] sm:$0x7f]  }
  0xaa   : > { %1009 = vmatprep.subr.bf16.mxu0 %v3335_v7  ;;  %v3366_v7 = vld [vmem:[%s4540_s3] sm:$0x7f]  }
  0xad   : > { %1010 = vmatpush1.bf16.msra.mxu0 %v3333_v5  ;;  %v3368_v5 = vld [vmem:[%s4541_s4] sm:$0xff]  }
  0xae   : > { %1011 = vmatprep.subr.bf16.mxu0 %v3338_v6  ;;  %v3369_v6 = vld [vmem:[%s4541_s4 + $0x8] sm:$0xff]  }
  0xb1   : > { %1012 = vmatpush1.bf16.msra.mxu0 %v3336_v9  ;;  %v3370_v9 = vld [vmem:[%s4541_s4 + $0x10] sm:$0xff]  }
  0xb2   : > { %1013 = vmatprep.subr.bf16.mxu0 %v3341_v10  ;;  %v3371_v10 = vld [vmem:[%s4541_s4 + $0x18] sm:$0xff]  }
  0xb5   : > { %1014 = vmatpush1.bf16.msra.mxu0 %v3339_v11  ;;  %v3372_v11 = vld [vmem:[%s4541_s4 + $0x20] sm:$0xff]  }
  0xb6   : > { %1015 = vmatprep.subr.bf16.mxu0 %v3344_v12  ;;  %v3373_v12 = vld [vmem:[%s4541_s4 + $0x28] sm:$0xff]  }
  0xb9   : > { %1016 = vmatpush1.bf16.msra.mxu0 %v3342_v13  ;;  %v3374_v13 = vld [vmem:[%s4541_s4 + $0x30] sm:$0xff]  }
  0xba   : > { %1017 = vmatprep.subr.bf16.mxu0 %v3347_v14  ;;  %v3375_v14 = vld [vmem:[%s4541_s4 + $0x38] sm:$0xff]  }
  0xbd   : > { %1018 = vmatpush1.bf16.msra.mxu0 %v3345_v15  ;;  %v3376_v15 = vld [vmem:[%s4541_s4 + $0x40] sm:$0xff]  }
  0xbe   : > { %1019 = vmatprep.subr.bf16.mxu0 %v3350_v16  ;;  %v3377_v16 = vld [vmem:[%s4541_s4 + $0x48] sm:$0xff]  }
  0xc1   : > { %1020 = vmatpush1.bf16.msra.mxu0 %v3348_v17  ;;  %v3378_v17 = vld [vmem:[%s4541_s4 + $0x50] ss:$0 sps:$4 sm:$0xff]  }
  0xc2   : > { %1021 = vmatprep.subr.bf16.mxu0 %v3353_v18  ;;  %v1279_v18 = vsel %vm1277_vm8, %v3378_v17, 0  ;;  %v3432_v17 = vld [vmem:[%s4542_s5 + $0xe0] ss:$8 sps:$4 sm:$0xff]  }
  0xc5   : > { %1022 = vmatpush1.bf16.msra.mxu0 %v3351_v19 }
  0xc6   : > { %1023 = vmatprep.subr.bf16.mxu0 %v3356_v20 }
  0xc9   : > { %1024 = vmatpush1.bf16.msra.mxu0 %v3354_v21 }
  0xca   : > { %1025 = vmatprep.subr.bf16.mxu0 %v3359_v22 }
  0xcd   : > { %1026 = vmatpush1.bf16.msra.mxu0 %v3357_v23 }
  0xce   : > { %1027 = vmatprep.subr.bf16.mxu0 %v3362_v24 }
  0xd1   : > { %1028 = vmatpush1.bf16.msra.mxu0 %v3360_v25 }
  0xd2   : > { %1029 = vmatprep.subr.bf16.mxu0 %v3365_v26 }
  0xd5   : > { %1030 = vmatpush1.bf16.msra.mxu0 %v3363_v27 }
  0xd8   : > { %1036 = vmatmul.mubr.bf16.vlgmr.msra.gmra.mrb[0].mxu0 %v567_v29 }
  0xd9   : > { %2923 = vmatprep.mubr.msk.bf16.mxu0 %vm551_vm4, %v549_v2  ;;  %vm2644_vm4 = vcmask 982016  }
  0xe0   : > { %1046 = vmatmul.mubr.bf16.gmra.mrb[4].mxu0 %v570_v31 }
  0xe1   : > { %1965 = vmatprep.mubr.bf16.mxu0 %v3596_v32 }
 0x1ab   : > { %v1037_v40 = vpop.f32.mrb[0].mxu0 }
 0x1ac   : > { %v3200_v41 = vadd.f32 %v1037_v40, %v637_v38  ;;  %v1039_v42 = vpop.f32.mrb[1].mxu0  ;;  %v3382_v40 = vld [vmem:[%s4541_s4 + $0x6c] sm:$0xff]  }
 0x1ad   : > { %v3201_v43 = vadd.f32 %v1039_v42, %v641_v39  ;;  %v1041_v44 = vpop.f32.mrb[2].mxu0  ;;  %v3384_v42 = vld [vmem:[%s4541_s4 + $0x7c] sm:$0xff]  }
 0x1ae   : > { %v3202_v45 = vadd.f32 %v1041_v44, %v637_v38  ;;  %v1043_v46 = vpop.f32.mrb[3].mxu0  ;;  %v1056_v48 = vmax.f32 %v3200_v41, 0.0  ;;  %v3383_v41 = vld [vmem:[%s4541_s4 + $0x74] sm:$0xff]   ;;  %v3386_v44 = vld [vmem:[%s4541_s4 + $0x8c] sm:$0xff]  }
 0x1af   : > { %v3203_v47 = vadd.f32 %v1043_v46, %v641_v39  ;;  %v1057_v50 = vmax.f32 %v3201_v43, 0.0  ;;  %v3385_v43 = vld [vmem:[%s4541_s4 + $0x84] sm:$0xff]   ;;  %v3388_v46 = vld [vmem:[%s4541_s4 + $0x9c] sm:$0xff]  }
 0x1b0   : > { %v1058_v49 = vmax.f32 %v3202_v45, 0.0  ;;  %v3387_v45 = vld [vmem:[%s4541_s4 + $0x94] sm:$0xff]  }
 0x1b1   : > { %v1059_v51 = vmax.f32 %v3203_v47, 0.0  ;;  %v3389_v47 = vld [vmem:[%s4541_s4 + $0xa4] ss:$0 sps:$4 sm:$0xff]  }
 0x1b2   : > { %v1064_v52 = vpack.c.bf16 %v1058_v49, %v1056_v48  ;;  %v1408_v48 = vsel %vm1277_vm8, %v3389_v47, 0  ;;  %v3390_v49 = vld [vmem:[%s4542_s5] ss:$8 sps:$4 sm:$0xff]  }
 0x1b3   : > { %v1047_v53 = vpop.f32.mrb[4].mxu0  ;;  %v1065_v54 = vpack.c.bf16 %v1059_v51, %v1057_v50  ;;  %v3392_v50 = vld [vmem:[%s4542_s5 + $0x4] ss:$8 sps:$4 sm:$0xff]   ;;  %v3395_v51 = vld [vmem:[%s4542_s5 + $0x14] ss:$8 sps:$4 sm:$0xff]  }
 0x1b4   : > { %v3204_v55 = vadd.f32 %v1047_v53, %v637_v38  ;;  %v1049_v56 = vpop.f32.mrb[5].mxu0  ;;  %v3398_v53 = vld [vmem:[%s4542_s5 + $0x24] ss:$8 sps:$4 sm:$0xff]  }
 0x1b5   : > { %v3205_v57 = vadd.f32 %v1049_v56, %v641_v39  ;;  %v1051_v58 = vpop.f32.mrb[6].mxu0  ;;  %1086 = vmatprep.subr.bf16.mxu1 %v1065_v54  ;;  %v3399_v56 = vld [vmem:[%s4542_s5 + $0x30] ss:$8 sps:$4 sm:$0xff]  }
 0x1b6   : > { %v3206_v59 = vadd.f32 %v1051_v58, %v637_v38  ;;  %v1053_v60 = vpop.f32.mrb[7].mxu0  ;;  %1087 = vmatpush1.bf16.msra.mxu1 %v1064_v52  ;;  %v1060_v62 = vmax.f32 %v3204_v55, 0.0  ;;  %v3380_v38 = vld [vmem:[%s4541_s4 + $0x5c] sm:$0xff]  }
 0x1b7   : > { %v3207_v61 = vadd.f32 %v1053_v60, %v641_v39  ;;  %v1061_v0 = vmax.f32 %v3205_v57, 0.0  ;;  %v3381_v39 = vld [vmem:[%s4541_s4 + $0x64] sm:$0xff]   ;;  %v3401_v55 = vld [vmem:[%s4542_s5 + $0x34] ss:$8 sps:$4 sm:$0xff]   ;;  %v3405_v60 = vld [vmem:[%s4542_s5 + $0x50] ss:$8 sps:$4 sm:$0xff]  }
 0x1b8   : > { %v1062_v63 = vmax.f32 %v3206_v59, 0.0  ;;  %v3404_v57 = vld [vmem:[%s4542_s5 + $0x44] ss:$8 sps:$4 sm:$0xff]   ;;  %v3402_v58 = vld [vmem:[%s4542_s5 + $0x40] ss:$8 sps:$4 sm:$0xff]  }
 0x1b9   : > { %v1063_v1 = vmax.f32 %v3207_v61, 0.0  ;;  %v3407_v59 = vld [vmem:[%s4542_s5 + $0x54] ss:$8 sps:$4 sm:$0xff]   ;;  %v3410_v61 = vld [vmem:[%s4542_s5 + $0x64] ss:$8 sps:$4 sm:$0xff]  }
 0x1ba   : > { %v1066_v2 = vpack.c.bf16 %v1062_v63, %v1060_v62  ;;  %v3408_v62 = vld [vmem:[%s4542_s5 + $0x60] ss:$8 sps:$4 sm:$0xff]   ;;  %v3413_v63 = vld [vmem:[%s4542_s5 + $0x74] ss:$8 sps:$4 sm:$0xff]  }
 0x1bb   : > { %v1067_v3 = vpack.c.bf16 %v1063_v1, %v1061_v0  ;;  %v3411_v0 = vld [vmem:[%s4542_s5 + $0x70] ss:$8 sps:$4 sm:$0xff]   ;;  %v3416_v1 = vld [vmem:[%s4542_s5 + $0x84] ss:$8 sps:$4 sm:$0xff]  }
 0x1bc   : > { %v1081_v4 = vsel %vm547_vm5, %v1066_v2, 0  ;;  %v3414_v2 = vld [vmem:[%s4542_s5 + $0x80] ss:$8 sps:$4 sm:$0xff]  }
 0x1bd   : > { %2925 = vmatprep.subr.msk.bf16.mxu1 %vm547_vm5, %v1067_v3 }
 0x1be   : > { %1089 = vmatpush1.bf16.msra.mxu1 %v1081_v4 }
 0x1bf   : > { %1140 = vmatprep.subr.bf16.mxu1 %v1065_v54  ;;  %v3396_v54 = vld [vmem:[%s4542_s5 + $0x20] ss:$8 sps:$4 sm:$0xff]  }
 0x1c1   : > { %2926 = vmatmul.mubr.msk.bf16.vlgmr.msra.gmra.mrb[0].mxu1 %vm1075_vm7, %v3366_v7  ;;  %v3422_v7 = vld [vmem:[%s4542_s5 + $0xa4] ss:$8 sps:$4 sm:$0xff]  }
 0x1c2   : > { %1141 = vmatpush1.bf16.msra.mxu1 %v1064_v52  ;;  %1172 = vmatprep.mubr.bf16.mxu1 %v3596_v32  ;;  %v3393_v52 = vld [vmem:[%s4542_s5 + $0x10] ss:$8 sps:$4 sm:$0xff]  }
 0x1c3   : > { %2930 = vmatprep.subr.msk.bf16.mxu1 %vm547_vm5, %v1067_v3  ;;  %v3419_v3 = vld [vmem:[%s4542_s5 + $0x94] ss:$8 sps:$4 sm:$0xff]   ;;  %vm2784_vm5 = vcmask 73728  }
 0x1c6   : > { %1143 = vmatpush1.bf16.msra.mxu1 %v1081_v4  ;;  %v3417_v4 = vld [vmem:[%s4542_s5 + $0x90] ss:$8 sps:$4 sm:$0xff]  }
 0x1c7   : > { %1281 = vmatprep.subr.bf16.mxu1 %v3596_v32 }
 0x1c9   : > { %2931 = vmatmul.mubr.msk.bf16.vlgmr.msra.gmra.mrb[4].mxu1 %vm1075_vm7, %v3367_v8  ;;  %v3420_v8 = vld [vmem:[%s4542_s5 + $0xa0] ss:$8 sps:$4 sm:$0xff]  }
 0x1ca   : > { %1282 = vmatpush1.bf16.msra.mxu1 %v3368_v5  ;;  %v3425_v5 = vld [vmem:[%s4542_s5 + $0xb4] ss:$8 sps:$4 sm:$0xff]  }
 0x1cb   : > { %1283 = vmatprep.subr.bf16.mxu1 %v3596_v32 }
 0x1ce   : > { %1284 = vmatpush1.bf16.msra.mxu1 %v3369_v6  ;;  %v3423_v6 = vld [vmem:[%s4542_s5 + $0xb0] ss:$8 sps:$4 sm:$0xff]  }
 0x1cf   : > { %1285 = vmatprep.subr.bf16.mxu1 %v3596_v32 }
 0x1d2   : > { %1286 = vmatpush1.bf16.msra.mxu1 %v3370_v9  ;;  %v3428_v9 = vld [vmem:[%s4542_s5 + $0xc4] ss:$8 sps:$4 sm:$0xff]  }
 0x1d3   : > { %1287 = vmatprep.subr.bf16.mxu1 %v3596_v32 }
 0x1d6   : > { %1288 = vmatpush1.bf16.msra.mxu1 %v3371_v10  ;;  %v3426_v10 = vld [vmem:[%s4542_s5 + $0xc0] ss:$8 sps:$4 sm:$0xff]  }
 0x1d7   : > { %1289 = vmatprep.subr.bf16.mxu1 %v3596_v32 }
 0x1da   : > { %1290 = vmatpush1.bf16.msra.mxu1 %v3372_v11  ;;  %v3431_v11 = vld [vmem:[%s4542_s5 + $0xd4] ss:$8 sps:$4 sm:$0xff]  }
 0x1db   : > { %1291 = vmatprep.subr.bf16.mxu1 %v3596_v32 }
 0x1de   : > { %1292 = vmatpush1.bf16.msra.mxu1 %v3373_v12  ;;  %v3429_v12 = vld [vmem:[%s4542_s5 + $0xd0] ss:$8 sps:$4 sm:$0xff]  }
 0x1df   : > { %1293 = vmatprep.subr.bf16.mxu1 %v3596_v32 }
 0x1e2   : > { %1294 = vmatpush1.bf16.msra.mxu1 %v3374_v13 }
 0x1e3   : > { %1295 = vmatprep.subr.bf16.mxu1 %v3596_v32 }
 0x1e6   : > { %1296 = vmatpush1.bf16.msra.mxu1 %v3375_v14 }
 0x1e7   : > { %1297 = vmatprep.subr.bf16.mxu1 %v3596_v32 }
 0x1ea   : > { %1298 = vmatpush1.bf16.msra.mxu1 %v3376_v15 }
 0x1eb   : > { %1299 = vmatprep.subr.bf16.mxu1 %v3596_v32 }
 0x1ee   : > { %1300 = vmatpush1.bf16.msra.mxu1 %v3377_v16 }
 0x1ef   : > { %1301 = vmatprep.subr.bf16.mxu1 %v3596_v32 }
 0x1f2   : > { %1302 = vmatpush1.bf16.msra.mxu1 %v1279_v18  ;;  %v3434_v18 = vld [vmem:[%s4542_s5 + $0xe4] ss:$8 sps:$4 sm:$0xff]  }
 0x1f3   : > { %1410 = vmatprep.subr.bf16.mxu1 %v3596_v32 }
 0x294   : > { %v1120_v19 = vpop.f32.mrb[0].mxu1 }
 0x295   : > { %v1122_v20 = vpop.f32.mrb[1].mxu1 }
 0x296   : > { %v1124_v21 = vpop.f32.mrb[2].mxu1 }
 0x297   : > { %v1126_v22 = vpop.f32.mrb[3].mxu1 }
 0x29c   : > { %v1174_v23 = vpop.f32.mrb[4].mxu1 }
 0x29d   : > { %v1183_v24 = vmax.f32 %v1120_v19, %v1174_v23  ;;  %v1176_v25 = vpop.f32.mrb[5].mxu1  ;;  %v3437_v19 = vld [vmem:[%s4542_s5 + $0xf4] ss:$8 sps:$4 sm:$0xff]  }
 0x29e   : > { %v1184_v26 = vmax.f32 %v1122_v20, %v1176_v25  ;;  %v1178_v27 = vpop.f32.mrb[6].mxu1 }
 0x29f   : > { %v1185_v28 = vmax.f32 %v1124_v21, %v1178_v27  ;;  %v1180_v29 = vpop.f32.mrb[7].mxu1  ;;  %v3435_v21 = vld [vmem:[%s4542_s5 + $0xf0] ss:$8 sps:$4 sm:$0xff]   ;;  %v3440_v27 = vld [vmem:[%s4542_s5 + $0x104] ss:$8 sps:$4 sm:$0xff]  }
 0x2a0   : > { %v1186_v30 = vmax.f32 %v1126_v22, %v1180_v29 }
 0x2a1   : > { %v1187_v31 = vpack.c.bf16 %v1185_v28, %v1183_v24 }
 0x2a2   : > { %v1188_v33 = vpack.c.bf16 %v1186_v30, %v1184_v26 }
 0x2a4   : > { %2943 = vmatprep.mubr.msk.bf16.mxu1 %vm1273_vm9, %v1188_v33 }
 0x2a5   : > { %1314 = vmatmul.mubr.bf16.vlgmr.msra.gmra.mrb[8].mxu1 %v1187_v31 }
 0x2a6   : > { %1411 = vmatpush1.bf16.msra.mxu1 %v3379_v36  ;;  %2976 = vmatprep.mubr.msk.bf16.mxu1 %vm1273_vm9, %v1188_v33 }
 0x2a7   : > { %1412 = vmatprep.subr.bf16.mxu1 %v3596_v32 }
 0x2aa   : > { %1413 = vmatpush1.bf16.msra.mxu1 %v3380_v38 }
 0x2ab   : > { %1414 = vmatprep.subr.bf16.mxu1 %v3596_v32 }
 0x2ae   : > { %1415 = vmatpush1.bf16.msra.mxu1 %v3381_v39 }
 0x2af   : > { %1416 = vmatprep.subr.bf16.mxu1 %v3596_v32 }
 0x2b2   : > { %1417 = vmatpush1.bf16.msra.mxu1 %v3382_v40 }
 0x2b3   : > { %1418 = vmatprep.subr.bf16.mxu1 %v3596_v32 }
 0x2b6   : > { %1419 = vmatpush1.bf16.msra.mxu1 %v3383_v41 }
 0x2b7   : > { %1420 = vmatprep.subr.bf16.mxu1 %v3596_v32 }
 0x2ba   : > { %1421 = vmatpush1.bf16.msra.mxu1 %v3384_v42 }
 0x2bb   : > { %1422 = vmatprep.subr.bf16.mxu1 %v3596_v32 }
 0x2be   : > { %1423 = vmatpush1.bf16.msra.mxu1 %v3385_v43 }
 0x2bf   : > { %1424 = vmatprep.subr.bf16.mxu1 %v3596_v32 }
 0x2c2   : > { %1425 = vmatpush1.bf16.msra.mxu1 %v3386_v44 }
 0x2c3   : > { %1426 = vmatprep.subr.bf16.mxu1 %v3596_v32 }
 0x2c6   : > { %1427 = vmatpush1.bf16.msra.mxu1 %v3387_v45 }
 0x2c7   : > { %1428 = vmatprep.subr.bf16.mxu1 %v3596_v32 }
 0x2ca   : > { %1429 = vmatpush1.bf16.msra.mxu1 %v3388_v46  ;;  %v3438_v46 = vld [vmem:[%s4542_s5 + $0x100] ss:$8 sps:$4 sm:$0xff]  }
 0x2cb   : > { %1430 = vmatprep.subr.bf16.mxu1 %v3596_v32 }
 0x2ce   : > { %1431 = vmatpush1.bf16.msra.mxu1 %v1408_v48  ;;  %v3443_v48 = vld [vmem:[%s4542_s5 + $0x114] ss:$8 sps:$4 sm:$0xff]  }
 0x2cf   : > { %1829 = vmatprep.subr.bf16.mxu1 %v3392_v50 }
 0x2d1   : > { %1443 = vmatmul.mubr.bf16.vlgmr.msra.gmra.mrb[12].mxu1 %v1187_v31 }
 0x2d2   : > { %1830 = vmatpush1.bf16.msra.mxu1 %v3390_v49 }
 0x2d3   : > { %1831 = vmatprep.subr.bf16.mxu1 %v3395_v51  ;;  %v3441_v51 = vld [vmem:[%s4542_s5 + $0x110] ss:$8 sps:$4 sm:$0xff]  }
 0x2d6   : > { %1832 = vmatpush1.bf16.msra.mxu1 %v3393_v52  ;;  %v3446_v52 = vld [vmem:[%s4542_s5 + $0x124] ss:$8 sps:$4 sm:$0xff]  }
 0x2d7   : > { %1833 = vmatprep.subr.bf16.mxu1 %v3398_v53  ;;  %v3444_v53 = vld [vmem:[%s4542_s5 + $0x120] ss:$8 sps:$4 sm:$0xff]  }
 0x2da   : > { %1834 = vmatpush1.bf16.msra.mxu1 %v3396_v54  ;;  %v3449_v54 = vld [vmem:[%s4542_s5 + $0x134] ss:$8 sps:$4 sm:$0xff]  }
 0x2db   : > { %1835 = vmatprep.subr.bf16.mxu1 %v3401_v55  ;;  %v3447_v55 = vld [vmem:[%s4542_s5 + $0x130] ss:$8 sps:$4 sm:$0xff]  }
 0x2de   : > { %1836 = vmatpush1.bf16.msra.mxu1 %v3399_v56  ;;  %v3452_v56 = vld [vmem:[%s4542_s5 + $0x144] ss:$8 sps:$4 sm:$0xff]  }
 0x2df   : > { %1837 = vmatprep.subr.bf16.mxu1 %v3404_v57  ;;  %v3450_v57 = vld [vmem:[%s4542_s5 + $0x140] ss:$8 sps:$4 sm:$0xff]  }
 0x2e2   : > { %1838 = vmatpush1.bf16.msra.mxu1 %v3402_v58  ;;  %v3455_v58 = vld [vmem:[%s4542_s5 + $0x154] ss:$8 sps:$4 sm:$0xff]  }
 0x2e3   : > { %1839 = vmatprep.subr.bf16.mxu1 %v3407_v59  ;;  %v3453_v59 = vld [vmem:[%s4542_s5 + $0x150] ss:$8 sps:$4 sm:$0xff]  }
 0x2e6   : > { %1840 = vmatpush1.bf16.msra.mxu1 %v3405_v60  ;;  %v3458_v60 = vld [vmem:[%s4542_s5 + $0x164] ss:$8 sps:$4 sm:$0xff]  }
 0x2e7   : > { %1841 = vmatprep.subr.bf16.mxu1 %v3410_v61  ;;  %v3456_v61 = vld [vmem:[%s4542_s5 + $0x160] ss:$8 sps:$4 sm:$0xff]  }
 0x2ea   : > { %1842 = vmatpush1.bf16.msra.mxu1 %v3408_v62  ;;  %v3461_v62 = vld [vmem:[%s4542_s5 + $0x174] ss:$8 sps:$4 sm:$0xff]  }
 0x2eb   : > { %1843 = vmatprep.subr.bf16.mxu1 %v3413_v63  ;;  %v3459_v63 = vld [vmem:[%s4542_s5 + $0x170] ss:$8 sps:$4 sm:$0xff]  }
 0x2ee   : > { %1844 = vmatpush1.bf16.msra.mxu1 %v3411_v0  ;;  %v3464_v0 = vld [vmem:[%s4542_s5 + $0x184] ss:$8 sps:$4 sm:$0xff]  }
 0x2ef   : > { %1845 = vmatprep.subr.bf16.mxu1 %v3416_v1  ;;  %v3462_v1 = vld [vmem:[%s4542_s5 + $0x180] ss:$8 sps:$4 sm:$0xff]  }
 0x2f2   : > { %1846 = vmatpush1.bf16.msra.mxu1 %v3414_v2  ;;  %v3467_v2 = vld [vmem:[%s4542_s5 + $0x194] ss:$8 sps:$4 sm:$0xff]  }
 0x2f3   : > { %1847 = vmatprep.subr.bf16.mxu1 %v3419_v3  ;;  %v1541_v3 = vld [vmem:[%s4542_s5 + $0x1a0] sm:$0x33] }
 0x2f6   : > { %1848 = vmatpush1.bf16.msra.mxu1 %v3417_v4  ;;  %v3465_v4 = vld [vmem:[%s4542_s5 + $0x190] ss:$8 sps:$4 sm:$0xff]  }
 0x2f7   : > { %1849 = vmatprep.subr.bf16.mxu1 %v3422_v7  ;;  %v3030_v7 = vcombine.high %v1541_v3, %v1541_v3 }
 0x2fa   : > { %1850 = vmatpush1.bf16.msra.mxu1 %v3420_v8  ;;  %v3029_v8 = vcombine.low %v1541_v3, %v1541_v3  ;;  %v3496_v3 = vld [vmem:[%s4546_s9 + $0x8] sm:$0xff]  }
 0x2fb   : > { %1851 = vmatprep.subr.bf16.mxu1 %v3425_v5 }
 0x2fc   : > { %v1824_v5 = vsel %vm1822_vm13, %v3029_v8, 0  ;;  %v3499_v8 = vld [vmem:[%s4546_s9 + $0x10] sm:$0xff]  }
 0x2fe   : > { %1852 = vmatpush1.bf16.msra.mxu1 %v3423_v6 }
 0x2ff   : > { %1853 = vmatprep.subr.bf16.mxu1 %v3428_v9  ;;  %v1542_v9 = vld [vmem:[%s4543_s6] sm:$0x3] }
 0x302   : > { %1854 = vmatpush1.bf16.msra.mxu1 %v3426_v10  ;;  %v1547_v10 = vrot.slane %v1542_v9, %v636_v35  ;;  %v3035_v35 = vld [vmem:[%s4544_s7 + $0x4] sm:$0x7] }
 0x303   : > { %1855 = vmatprep.subr.bf16.mxu1 %v3431_v11  ;;  %v1551_v11 = vrot.slane %v1542_v9, %v640_v37  ;;  %v3470_v37 = vld [vmem:[%s4545_s8] sm:$0xff]   ;;  %v3502_v9 = vld [vmem:[%s4546_s9 + $0x18] sm:$0xff]  }
 0x306   : > { %1856 = vmatpush1.bf16.msra.mxu1 %v3429_v12 }
 0x307   : > { %1857 = vmatprep.subr.bf16.mxu1 %v3434_v18 }
 0x30a   : > { %1858 = vmatpush1.bf16.msra.mxu1 %v3432_v17 }
 0x30b   : > { %1859 = vmatprep.subr.bf16.mxu1 %v3437_v19 }
 0x30e   : > { %1860 = vmatpush1.bf16.msra.mxu1 %v3435_v21 }
 0x30f   : > { %1872 = vmatprep.subr.bf16.mxu1 %v3440_v27  ;;  %v3471_v27 = vld [vmem:[%s4545_s8 + $0x8] sm:$0xff]  }
 0x378   : > { %v1315_v13 = vpop.f32.mrb[8].mxu1 }
 0x379   : > { %v1317_v14 = vpop.f32.mrb[9].mxu1 }
 0x37a   : > { %v1318_v15 = vpop.f32.mrb[10].mxu1 }
 0x37b   : > { %v1320_v16 = vpop.f32.mrb[11].mxu1 }
 0x3a4   : > { %v1444_v20 = vpop.f32.mrb[12].mxu1 }
 0x3a5   : > { %v1451_v22 = vmax.f32 %v1315_v13, %v1444_v20  ;;  %v1446_v23 = vpop.f32.mrb[13].mxu1 }
 0x3a6   : > { %v1447_v24 = vpop.f32.mrb[14].mxu1 }
 0x3a7   : > { %v1452_v25 = vmax.f32 %v1318_v15, %v1447_v24  ;;  %v1449_v26 = vpop.f32.mrb[15].mxu1 }
 0x3a9   : > { %v1453_v28 = vpack.c.bf16 %v1452_v25, %v1451_v22 }
 0x3ab   : > { %v1464_v29 = vrot.slane %v1453_v28, 1  ;;  %v1455_v30 = vshrl.u32 %v1453_v28, 16  ;;  %v1457_v31 = vshll.u32 %v1453_v28, 16  ;;  %v1472_v36 = vrot.slane %v1453_v28, 2 }
 0x3ad   : > { %1465 = vrot.lane.b32.xlu1 %v1464_v29, %s3597_s30  ;;  %v1459_v33 = vrot.slane %v1457_v31, 1  ;;  %v1467_v39 = vrot.slane %v1455_v30, 1  ;;  %v1468_v40 = vrot.slane %v1457_v31, 2  ;;  %v3473_v29 = vld [vmem:[%s4545_s8 + $0x18] sm:$0xff]   ;;  %v3475_v31 = vld [vmem:[%s4545_s8 + $0x28] sm:$0xff]  }
 0x3af   : > { %v1460_v38 = vor.u32 %v1459_v33, %v1455_v30  ;;  %v1469_v41 = vor.u32 %v1468_v40, %v1467_v39  ;;  %v3474_v30 = vld [vmem:[%s4545_s8 + $0x20] sm:$0xff]   ;;  %v3476_v33 = vld [vmem:[%s4545_s8 + $0x30] sm:$0xff]   ;;  %v3479_v39 = vld [vmem:[%s4545_s8 + $0x48] sm:$0xff]  }
 0x3b1   : > { %1473 = vrot.lane.b32.xlu1 %v1472_v36, %s3598_s23  ;;  %1461 = vrot.lane.b32.xlu0 %v1460_v38, %s3599_s25  ;;  %v3477_v36 = vld [vmem:[%s4545_s8 + $0x38] sm:$0xff]   ;;  %v3478_v38 = vld [vmem:[%s4545_s8 + $0x40] sm:$0xff]   ;;  %s4569_s25 = sld [smem:[#allocation11_spill]] }
 0x3b5   : > { %1470 = vrot.lane.b32.xlu0 %v1469_v41, %s3600_s26 }
 0x41f   : > { %v1466_v43 = vpop.permute.xlu1 %1465 }
 0x423   : > { %v1462_v42 = vpop.permute.xlu0 %1461  ;;  %v1474_v50 = vpop.permute.xlu1 %1473 }
 0x424   : > { %v1480_v44 = vsel %vm1273_vm9, %v1462_v42, %v1466_v43  ;;  %v1477_v49 = vsel %vm1475_vm11, %v1453_v28, %v1462_v42  ;;  %v3472_v28 = vld [vmem:[%s4545_s8 + $0x10] sm:$0xff]  }
 0x427   : > { %v1471_v45 = vpop.permute.xlu0 %1470 }
 0x428   : > { %v1483_v47 = vsel %vm1481_vm10, %v1480_v44, %v1471_v45  ;;  %v1487_v6 = vsel %vm1485_vm14, %v1471_v45, %v1474_v50 }
 0x429   : > { %1861 = vmatprep.mubr.bf16.mxu1 %v1483_v47 }
 0x42a   : > { %1862 = vmatmul.mubr.bf16.vlgmr.msra.gmra.mrb[16].mxu1 %v1477_v49 }
 0x42b   : > { %1873 = vmatpush1.bf16.msra.mxu1 %v3438_v46  ;;  %3032 = vmatprep.mubr.msk.bf16.mxu1 %vm1819_vm12, %v1474_v50 }
 0x42c   : > { %1874 = vmatprep.subr.bf16.mxu1 %v3443_v48 }
 0x42f   : > { %1875 = vmatpush1.bf16.msra.mxu1 %v3441_v51  ;;  %v3480_v51 = vld [vmem:[%s4545_s8 + $0x50] sm:$0xff]  }
 0x430   : > { %1876 = vmatprep.subr.bf16.mxu1 %v3446_v52 }
 0x433   : > { %1877 = vmatpush1.bf16.msra.mxu1 %v3444_v53  ;;  %v3481_v53 = vld [vmem:[%s4545_s8 + $0x58] sm:$0xff]  }
 0x434   : > { %1878 = vmatprep.subr.bf16.mxu1 %v3449_v54  ;;  %v3482_v54 = vld [vmem:[%s4545_s8 + $0x60] sm:$0xff]  }
 0x437   : > { %1879 = vmatpush1.bf16.msra.mxu1 %v3447_v55  ;;  %v3483_v55 = vld [vmem:[%s4545_s8 + $0x68] sm:$0xff]  }
 0x438   : > { %1880 = vmatprep.subr.bf16.mxu1 %v3452_v56  ;;  %v3484_v56 = vld [vmem:[%s4545_s8 + $0x70] sm:$0xff]  }
 0x43b   : > { %1881 = vmatpush1.bf16.msra.mxu1 %v3450_v57  ;;  %v3485_v57 = vld [vmem:[%s4545_s8 + $0x78] sm:$0xff]  }
 0x43c   : > { %1882 = vmatprep.subr.bf16.mxu1 %v3455_v58  ;;  %v3486_v58 = vld [vmem:[%s4545_s8 + $0x80] sm:$0xff]  }
 0x43f   : > { %1883 = vmatpush1.bf16.msra.mxu1 %v3453_v59  ;;  %v3487_v59 = vld [vmem:[%s4545_s8 + $0x88] sm:$0xff]  }
 0x440   : > { %1884 = vmatprep.subr.bf16.mxu1 %v3458_v60  ;;  %v3488_v60 = vld [vmem:[%s4545_s8 + $0x90] sm:$0xff]  }
 0x443   : > { %1885 = vmatpush1.bf16.msra.mxu1 %v3456_v61  ;;  %v3489_v61 = vld [vmem:[%s4545_s8 + $0x98] sm:$0xff]  }
 0x444   : > { %1886 = vmatprep.subr.bf16.mxu1 %v3461_v62  ;;  %v3490_v62 = vld [vmem:[%s4546_s9 + $0x80] sm:$0xff]  }
 0x447   : > { %1887 = vmatpush1.bf16.msra.mxu1 %v3459_v63  ;;  %v3491_v63 = vld [vmem:[%s4546_s9 + $0x40] sm:$0xff]  }
 0x448   : > { %1888 = vmatprep.subr.bf16.mxu1 %v3464_v0  ;;  %v3493_v0 = vld [vmem:[%s4546_s9] sm:$0xff]  }
 0x44b   : > { %1889 = vmatpush1.bf16.msra.mxu1 %v3462_v1  ;;  %v3494_v1 = vld [vmem:[%s4546_s9 + $0x48] sm:$0xff]  }
 0x44c   : > { %1890 = vmatprep.subr.bf16.mxu1 %v3467_v2  ;;  %v3492_v2 = vld [vmem:[%s4546_s9 + $0x88] sm:$0xff]  }
 0x44f   : > { %1891 = vmatpush1.bf16.msra.mxu1 %v3465_v4  ;;  %v3497_v4 = vld [vmem:[%s4546_s9 + $0x50] sm:$0xff]  }
 0x450   : > { %3031 = vmatprep.subr.msk.bf16.mxu1 %vm1822_vm13, %v3030_v7  ;;  %v3495_v7 = vld [vmem:[%s4546_s9 + $0x90] sm:$0xff]  }
 0x453   : > { %1893 = vmatpush1.bf16.msra.mxu1 %v1824_v5  ;;  %v3500_v5 = vld [vmem:[%s4546_s9 + $0x58] sm:$0xff]  }
 0x454   : > { %3126 = vmatprep.subr.bf16.mxu1 %v3491_v63 }
 0x456   : > { %1905 = vmatmul.mubr.bf16.vlgmr.msra.gmra.mrb[16].mxu1 %v1487_v6  ;;  %v3498_v6 = vld [vmem:[%s4546_s9 + $0x98] sm:$0xff]  }
 0x457   : > { %3127 = vmatpush3.bf16.msra.mxu1 %v3493_v0 }
 0x458   : > { %3128 = vmatprep.subr.bf16.mxu1 %v3494_v1 }
 0x45b   : > { %3129 = vmatpush3.bf16.msra.mxu1 %v3496_v3 }
 0x45c   : > { %3130 = vmatprep.subr.bf16.mxu1 %v3497_v4 }
 0x45f   : > { %3131 = vmatpush3.bf16.msra.mxu1 %v3499_v8 }
 0x460   : > { %3132 = vmatprep.subr.bf16.mxu1 %v3500_v5 }
 0x463   : > { %3133 = vmatpush3.bf16.msra.mxu1 %v3502_v9  ;;  %v3527_v9 = vld [vmem:[%s4550_s13 + $0x20] sm:$0xff]  }
 0x529   : > { %v1906_v12 = vpop.f32.mrb[16].mxu1 }
 0x52a   : > { %v3208_v13 = vadd.f32 %v1906_v12, %v1547_v10  ;;  %v1908_v14 = vpop.f32.mrb[17].mxu1  ;;  %v3505_v12 = vld [vmem:[%s4546_s9 + $0x20] sm:$0xff]  }
 0x52b   : > { %v3209_v15 = vadd.f32 %v1908_v14, %v1551_v11  ;;  %v1910_v16 = vpop.f32.mrb[18].mxu1  ;;  %v3504_v14 = vld [vmem:[%s4546_s9 + $0xa8] sm:$0xff]  }
 0x52c   : > { %v3210_v17 = vadd.f32 %v1910_v16, %v1547_v10  ;;  %v1912_v18 = vpop.f32.mrb[19].mxu1  ;;  %v1915_v20 = vmax.f32 %v3208_v13, 0.0  ;;  %v3503_v10 = vld [vmem:[%s4546_s9 + $0x60] sm:$0xff]   ;;  %v3506_v13 = vld [vmem:[%s4546_s9 + $0x68] sm:$0xff]   ;;  %v3509_v16 = vld [vmem:[%s4546_s9 + $0x70] sm:$0xff]  }
 0x52d   : > { %v3211_v19 = vadd.f32 %v1912_v18, %v1551_v11  ;;  %v1916_v22 = vmax.f32 %v3209_v15, 0.0  ;;  %v3501_v11 = vld [vmem:[%s4546_s9 + $0xa0] sm:$0xff]   ;;  %3134 = vmatprep.subr.bf16.mxu1 %v3503_v10  ;;  %v3508_v15 = vld [vmem:[%s4546_s9 + $0x28] sm:$0xff]   ;;  %v3511_v18 = vld [vmem:[%s4546_s9 + $0x30] sm:$0xff]  }
 0x52e   : > { %v1917_v21 = vmax.f32 %v3210_v17, 0.0  ;;  %3135 = vmatpush3.bf16.msra.mxu1 %v3505_v12  ;;  %v3507_v17 = vld [vmem:[%s4546_s9 + $0xb0] sm:$0xff]   ;;  %v3528_v10 = vld [vmem:[%s4550_s13 + $0x28] ss:$0 sps:$4 sm:$0x33]  }
 0x52f   : > { %v1918_v23 = vmax.f32 %v3211_v19, 0.0  ;;  %3136 = vmatprep.subr.bf16.mxu1 %v3506_v13  ;;  %v3510_v19 = vld [vmem:[%s4546_s9 + $0xb8] sm:$0xff]   ;;  %v2598_v12 = vld [vmem:[%s4549_s12] sm:$0x1] }
 0x530   : > { %v1919_v24 = vpack.c.bf16 %v1917_v21, %v1915_v20 }
 0x531   : > { %v1920_v25 = vpack.c.bf16 %v1918_v23, %v1916_v22 }
 0x532   : > { %v1928_v26 = vsel %vm1926_vm15, %v1919_v24, 0  ;;  %3137 = vmatpush3.bf16.msra.mxu1 %v3508_v15  ;;  %v3512_v24 = vld [vmem:[%s4546_s9 + $0x78] sm:$0xff]  }
 0x533   : > { %3033 = vmatprep.subr.msk.bf16.mxu0 %vm1926_vm15, %v1920_v25  ;;  %3138 = vmatprep.subr.bf16.mxu1 %v3509_v16 }
 0x534   : > { %1934 = vmatpush1.bf16.msra.mxu0 %v1928_v26 }
 0x535   : > { %3036 = vmatprep.subr.msk.bf16.mxu0 %vm1926_vm15, %v1920_v25  ;;  %v3513_v25 = vld [vmem:[%s4546_s9 + $0xc0] sm:$0xff]  }
 0x536   : > { %3139 = vmatpush3.bf16.msra.mxu1 %v3511_v18 }
 0x537   : > { %3034 = vmatmul.mubr.msk.bf16.vlgmr.msra.gmra.mrb[8].mxu0 %vm1922_vm0, %v1921_v34  ;;  %3140 = vmatprep.subr.bf16.mxu1 %v3512_v24 }
 0x538   : > { %1980 = vmatpush1.bf16.msra.mxu0 %v1928_v26  ;;  %2011 = vmatprep.mubr.bf16.mxu0 %v3596_v32  ;;  %v3514_v26 = vld [vmem:[%s4546_s9 + $0x38] sm:$0xff]  }
 0x539   : > { %2107 = vmatprep.subr.bf16.mxu0 %v3596_v32 }
 0x53a   : > { %3141 = vmatpush3.bf16.msra.mxu1 %v3514_v26 }
 0x53f   : > { %3037 = vmatmul.mubr.msk.bf16.vlgmr.msra.gmra.mrb[12].mxu0 %vm1922_vm0, %v3035_v35 }
 0x540   : > { %2108 = vmatpush1.bf16.msra.mxu0 %v3470_v37  ;;  %v3601_v37 = vmov 0.0  }
 0x541   : > { %2109 = vmatprep.subr.bf16.mxu0 %v3596_v32  ;;  %3164 = vmatprep.subr.bf16.mxu1 %v3601_v37 }
 0x544   : > { %2110 = vmatpush1.bf16.msra.mxu0 %v3471_v27 }
 0x545   : > { %2111 = vmatprep.subr.bf16.mxu0 %v3596_v32 }
 0x548   : > { %2112 = vmatpush1.bf16.msra.mxu0 %v3472_v28 }
 0x549   : > { %2113 = vmatprep.subr.bf16.mxu0 %v3596_v32 }
 0x54c   : > { %2114 = vmatpush1.bf16.msra.mxu0 %v3473_v29 }
 0x54d   : > { %2115 = vmatprep.subr.bf16.mxu0 %v3596_v32 }
 0x550   : > { %2116 = vmatpush1.bf16.msra.mxu0 %v3474_v30 }
 0x551   : > { %2117 = vmatprep.subr.bf16.mxu0 %v3596_v32 }
 0x554   : > { %2118 = vmatpush1.bf16.msra.mxu0 %v3475_v31 }
 0x555   : > { %2119 = vmatprep.subr.bf16.mxu0 %v3596_v32 }
 0x558   : > { %2120 = vmatpush1.bf16.msra.mxu0 %v3476_v33 }
 0x559   : > { %2121 = vmatprep.subr.bf16.mxu0 %v3596_v32 }
 0x55c   : > { %2122 = vmatpush1.bf16.msra.mxu0 %v3477_v36 }
 0x55d   : > { %2123 = vmatprep.subr.bf16.mxu0 %v3596_v32 }
 0x560   : > { %2124 = vmatpush1.bf16.msra.mxu0 %v3478_v38 }
 0x561   : > { %2125 = vmatprep.subr.bf16.mxu0 %v3596_v32 }
 0x564   : > { %2126 = vmatpush1.bf16.msra.mxu0 %v3479_v39 }
 0x565   : > { %2228 = vmatprep.subr.bf16.mxu0 %v3596_v32 }
 0x60a   : > { %v1967_v40 = vpop.f32.mrb[8].mxu0 }
 0x60b   : > { %v1969_v41 = vpop.f32.mrb[9].mxu0 }
 0x60c   : > { %v1971_v42 = vpop.f32.mrb[10].mxu0 }
 0x60d   : > { %v1972_v43 = vpop.f32.mrb[11].mxu0 }
 0x60e   : > { %v3515_v43 = vld [vmem:[%s4548_s11] sm:$0xff]  }
 0x612   : > { %v2013_v44 = vpop.f32.mrb[12].mxu0 }
 0x613   : > { %v2020_v45 = vmax.f32 %v1967_v40, %v2013_v44  ;;  %v2015_v46 = vpop.f32.mrb[13].mxu0 }
 0x614   : > { %v2021_v47 = vmax.f32 %v1969_v41, %v2015_v46  ;;  %v2017_v48 = vpop.f32.mrb[14].mxu0 }
 0x615   : > { %v2018_v49 = vpop.f32.mrb[15].mxu0  ;;  %v2022_v52 = vpack.c.bf16 %v2020_v45, %v2020_v45  ;;  %v3517_v48 = vld [vmem:[%s4548_s11 + $0x10] sm:$0xff]  }
 0x616   : > { %v2023_v50 = vpack.c.bf16 %v2021_v47, %v2021_v47  ;;  %v3516_v47 = vld [vmem:[%s4548_s11 + $0x8] sm:$0xff]   ;;  %v3518_v49 = vld [vmem:[%s4548_s11 + $0x18] sm:$0xff]  }
 0x618   : > { %3048 = vmatprep.mubr.msk.bf16.mxu0 %vm565_vm6, %v2023_v50 }
 0x619   : > { %2140 = vmatmul.mubr.bf16.vlgmr.msra.gmra.mrb[16].mxu0 %v2022_v52 }
 0x61a   : > { %2229 = vmatpush1.bf16.msra.mxu0 %v3480_v51  ;;  %3079 = vmatprep.mubr.msk.bf16.mxu0 %vm565_vm6, %v2023_v50  ;;  %v3519_v50 = vld [vmem:[%s4548_s11 + $0x20] sm:$0xff]   ;;  %v3520_v51 = vld [vmem:[%s4548_s11 + $0x28] sm:$0xff]  }
 0x61b   : > { %2230 = vmatprep.subr.bf16.mxu0 %v3596_v32 }
 0x61e   : > { %2231 = vmatpush1.bf16.msra.mxu0 %v3481_v53  ;;  %v3522_v53 = vld [vmem:[%s4548_s11 + $0x38] ss:$0 sps:$4 sm:$0xff]  }
 0x61f   : > { %2232 = vmatprep.subr.bf16.mxu0 %v3596_v32 }
 0x622   : > { %2233 = vmatpush1.bf16.msra.mxu0 %v3482_v54  ;;  %v2649_v54 = vsel %vm1277_vm8, %v3522_v53, 0 }
 0x623   : > { %2234 = vmatprep.subr.bf16.mxu0 %v3596_v32 }
 0x626   : > { %2235 = vmatpush1.bf16.msra.mxu0 %v3483_v55  ;;  %v3523_v55 = vld [vmem:[%s4550_s13] sm:$0xff]  }
 0x627   : > { %2236 = vmatprep.subr.bf16.mxu0 %v3596_v32 }
 0x62a   : > { %2237 = vmatpush1.bf16.msra.mxu0 %v3484_v56  ;;  %v3524_v56 = vld [vmem:[%s4550_s13 + $0x8] sm:$0xff]  }
 0x62b   : > { %2238 = vmatprep.subr.bf16.mxu0 %v3596_v32 }
 0x62e   : > { %2239 = vmatpush1.bf16.msra.mxu0 %v3485_v57  ;;  %v3525_v57 = vld [vmem:[%s4550_s13 + $0x10] sm:$0xff]  }
 0x62f   : > { %2240 = vmatprep.subr.bf16.mxu0 %v3596_v32 }
 0x632   : > { %2241 = vmatpush1.bf16.msra.mxu0 %v3486_v58  ;;  %v3526_v58 = vld [vmem:[%s4550_s13 + $0x18] sm:$0xff]  }
 0x633   : > { %2242 = vmatprep.subr.bf16.mxu0 %v3596_v32 }
 0x636   : > { %2243 = vmatpush1.bf16.msra.mxu0 %v3487_v59 }
 0x637   : > { %2244 = vmatprep.subr.bf16.mxu0 %v3596_v32 }
 0x63a   : > { %2245 = vmatpush1.bf16.msra.mxu0 %v3488_v60 }
 0x63b   : > { %2246 = vmatprep.subr.bf16.mxu0 %v3596_v32 }
 0x63e   : > { %2247 = vmatpush1.bf16.msra.mxu0 %v3489_v61 }
 0x63f   : > { %2541 = vmatprep.subr.bf16.mxu0 %v3596_v32 }
 0x641   : > { %2261 = vmatmul.mubr.bf16.vlgmr.msra.gmra.mrb[20].mxu0 %v2022_v52  ;;  %v3521_v52 = vld [vmem:[%s4548_s11 + $0x30] sm:$0xff]  }
 0x642   : > { %2542 = vmatpush1.bf16.msra.mxu0 %v3490_v62  ;;  %v2347_v62 = vld [vmem:[%s4547_s10] sm:$0x1] }
 0x643   : > { %2543 = vmatprep.subr.bf16.mxu0 %v3596_v32 }
 0x646   : > { %2544 = vmatpush1.bf16.msra.mxu0 %v3492_v2 }
 0x647   : > { %2545 = vmatprep.subr.bf16.mxu0 %v3596_v32 }
 0x64a   : > { %2546 = vmatpush1.bf16.msra.mxu0 %v3495_v7 }
 0x64b   : > { %2547 = vmatprep.subr.bf16.mxu0 %v3596_v32 }
 0x64e   : > { %2548 = vmatpush1.bf16.msra.mxu0 %v3498_v6 }
 0x64f   : > { %2549 = vmatprep.subr.bf16.mxu0 %v3596_v32 }
 0x652   : > { %2550 = vmatpush1.bf16.msra.mxu0 %v3501_v11  ;;  %v2742_v11 = vsel %vm1822_vm13, %v3528_v10, 0 }
 0x653   : > { %2551 = vmatprep.subr.bf16.mxu0 %v3596_v32 }
 0x656   : > { %2552 = vmatpush1.bf16.msra.mxu0 %v3504_v14 }
 0x657   : > { %2553 = vmatprep.subr.bf16.mxu0 %v3596_v32 }
 0x65a   : > { %2554 = vmatpush1.bf16.msra.mxu0 %v3507_v17 }
 0x65b   : > { %2555 = vmatprep.subr.bf16.mxu0 %v3596_v32 }
 0x65e   : > { %2556 = vmatpush1.bf16.msra.mxu0 %v3510_v19 }
 0x65f   : > { %2557 = vmatprep.subr.bf16.mxu0 %v3596_v32 }
 0x662   : > { %2558 = vmatpush1.bf16.msra.mxu0 %v3513_v25 }
 0x663   : > { %3184 = vmatprep.subr.bf16.mxu0 %v3601_v37 }
 0x6ec   : > { %v2141_v20 = vpop.f32.mrb[16].mxu0 }
 0x6ed   : > { %v2143_v21 = vpop.f32.mrb[17].mxu0 }
 0x6ee   : > { %v2144_v22 = vpop.f32.mrb[18].mxu0 }
 0x6ef   : > { %v2145_v23 = vpop.f32.mrb[19].mxu0 }
 0x714   : > { %v2262_v32 = vpop.f32.mrb[20].mxu0 }
 0x715   : > { %v2268_v34 = vmax.f32 %v2141_v20, %v2262_v32  ;;  %v2264_v35 = vpop.f32.mrb[21].mxu0  ;;  %v2704_v20 = vld [vmem:[%s4551_s14] sm:$0x1] }
 0x716   : > { %v2265_v27 = vpop.f32.mrb[22].mxu0 }
 0x717   : > { %v2269_v28 = vpack.c.bf16 %v2268_v34, %v2268_v34  ;;  %v2266_v29 = vpop.f32.mrb[23].mxu0 }
 0x719   : > { %v2276_v30 = vrot.slane %v2269_v28, 1  ;;  %v2271_v31 = vshrl.u32 %v2269_v28, 16  ;;  %v2282_v33 = vrot.slane %v2269_v28, 2 }
 0x71b   : > { %2277 = vrot.lane.b32.xlu1 %v2276_v30, %s3595_s27  ;;  %2273 = vrot.lane.b32.xlu0 %v2271_v31, %s3598_s23  ;;  %v2279_v36 = vrot.slane %v2271_v31, 1  ;;  %s3529_s27 = scalar_lea.vmem %s4497_s15, 16  ;;  %s3604_s23 = smov [#allocation2]  }
 0x71c   : > { %p3530_p11 = scmp.ne.s32.totalorder %s4497_s15, %s3529_s27  ;;  %s3533_s26 = sshll.u32 %s3604_s23, 4  ;;  %s3534_s26 = int_to_ptr.vmem [resolvable:$false] %s3533_s26 }
 0x71d   : > { %s3535_s17 = scalar_lea.vmem %s3534_s26, 32  ;;  %p3536_p0 = scmp.lt.s32.totalorder %s4497_s15, %s3534_s26 }
 0x71e   : > { %p3531_p12 = pnand %p3530_p11, %p3723_p5  ;;  %p3537_p1 = scmp.lt.s32.totalorder %s3535_s17, %s3529_s27 }
 0x71f   : > { %2283 = vrot.lane.b32.xlu1 %v2282_v33, %s3594_s24  ;;  %2280 = vrot.lane.b32.xlu0 %v2279_v36, %s3602_s29  ;;  %s4495_s24 = scalar_lea.hbm %s4569_s25, %s3122_s20 }
 0x720   : > { %p3532_p13 = pneg %p3531_p12  ;;  %p3538_p2 = por %p3537_p1, %p3536_p0 }
 0x722   : > { %p3539_p3 = pnand %p3538_p2, %p3532_p13 }
 0x78d   : > { %v2278_v38 = vpop.permute.xlu1 %2277  ;;  %v2274_v39 = vpop.permute.xlu0 %2273 }
 0x78e   : > { %v2289_v40 = vsel %vm565_vm6, %v2274_v39, %v2278_v38  ;;  %v2286_v46 = vsel %vm1485_vm14, %v2269_v28, %v2274_v39 }
 0x791   : > { %v2284_v41 = vpop.permute.xlu1 %2283  ;;  %v2281_v42 = vpop.permute.xlu0 %2280 }
 0x792   : > { %v2295_v44 = vsel %vm558_vm3, %v2281_v42, %v2284_v41  ;;  %3105 = vmatprep.mubr.msk.bf16.mxu0 %vm2498_vm1, %v2284_v41  ;;  %v2292_v45 = vsel %vm2290_vm2, %v2289_v40, %v2281_v42  ;;  %vm3603_vm3 = vmmov 0  }
 0x793   : > { %2533 = vmatprep.mubr.bf16.mxu1 %v2292_v45  ;;  %2574 = vmatmul.mubr.bf16.vlgmr.msra.gmra.mrb[24].mxu0 %v2295_v44 }
 0x794   : > { %2534 = vmatmul.mubr.bf16.vlgmr.msra.gmra.mrb[20].mxu1 %v2286_v46  ;;  %3196 = vmatprep.mubr.msk.bf16.mxu0 %vm3603_vm3, %v3601_v37 }
 0x795   : > { %3165 = vmatpush3.bf16.msra.mxu1 %v3515_v43  ;;  %3180 = vmatprep.mubr.msk.bf16.mxu1 %vm3603_vm3, %v3601_v37 }
 0x796   : > { %3166 = vmatprep.subr.bf16.mxu1 %v3601_v37  ;;  %3185 = vmatpush3.bf16.msra.mxu0 %v3523_v55 }
 0x797   : > { %3186 = vmatprep.subr.bf16.mxu0 %v3601_v37 }
 0x799   : > { %3167 = vmatpush3.bf16.msra.mxu1 %v3516_v47 }
 0x79a   : > { %3168 = vmatprep.subr.bf16.mxu1 %v3601_v37  ;;  %3187 = vmatpush3.bf16.msra.mxu0 %v3524_v56 }
 0x79b   : > { %3188 = vmatprep.subr.bf16.mxu0 %v3601_v37 }
 0x79d   : > { %3169 = vmatpush3.bf16.msra.mxu1 %v3517_v48 }
 0x79e   : > { %3170 = vmatprep.subr.bf16.mxu1 %v3601_v37  ;;  %3189 = vmatpush3.bf16.msra.mxu0 %v3525_v57 }
 0x79f   : > { %3190 = vmatprep.subr.bf16.mxu0 %v3601_v37 }
 0x7a1   : > { %3171 = vmatpush3.bf16.msra.mxu1 %v3518_v49 }
 0x7a2   : > { %3172 = vmatprep.subr.bf16.mxu1 %v3601_v37  ;;  %3191 = vmatpush3.bf16.msra.mxu0 %v3526_v58 }
 0x7a3   : > { %3192 = vmatprep.subr.bf16.mxu0 %v3601_v37 }
 0x7a5   : > { %3173 = vmatpush3.bf16.msra.mxu1 %v3519_v50 }
 0x7a6   : > { %3174 = vmatprep.subr.bf16.mxu1 %v3601_v37  ;;  %3193 = vmatpush3.bf16.msra.mxu0 %v3527_v9 }
 0x7a7   : > { %3194 = vmatprep.subr.bf16.mxu0 %v3601_v37 }
 0x7a9   : > { %3175 = vmatpush3.bf16.msra.mxu1 %v3520_v51 }
 0x7aa   : > { %3176 = vmatprep.subr.bf16.mxu1 %v3601_v37  ;;  %3195 = vmatpush3.bf16.msra.mxu0 %v2742_v11 }
 0x7ad   : > { %3177 = vmatpush3.bf16.msra.mxu1 %v3521_v52 }
 0x7ae   : > { %3178 = vmatprep.subr.bf16.mxu1 %v3601_v37 }
 0x7b1   : > { %3179 = vmatpush3.bf16.msra.mxu1 %v2649_v54 }
 0x866   : > { %v2575_v59 = vpop.f32.mrb[24].mxu0 }
 0x867   : > { %v3142_v60 = vpop.f32.mrb[20].mxu1  ;;  %v2577_v61 = vpop.f32.mrb[25].mxu0 }
 0x868   : > { %v3143_v63 = vpop.f32.mrb[21].mxu1  ;;  %v2578_v0 = vpop.f32.mrb[26].mxu0 }
 0x869   : > { %v3144_v1 = vadd.f32 %v3143_v63, %v3142_v60  ;;  %v3145_v2 = vpop.f32.mrb[22].mxu1  ;;  %v2579_v3 = vpop.f32.mrb[27].mxu0 }
 0x86a   : > { %v3146_v4 = vpop.f32.mrb[23].mxu1 }
 0x86b   : > { %v2536_v7 = vadd.f32 %v3144_v1, %v2347_v62 }
 0x86d   : > { %v2576_v8 = vadd.f32 %v2575_v59, %v2536_v7 }
 0x86f   : > { %v2581_v5 = vmax.f32 %v2576_v8, 0.0 }
 0x871   : > { %v2582_v6 = vpack.c.bf16 %v2581_v5, %v2581_v5 }
 0x873   : > { %3181 = vmatmul.mubr.msk.bf16.vlgmr.msra.gmra.mrb[24].mxu1 %vm2644_vm4, %v2582_v6 }
 0x946   : > { %v2685_v13 = vpop.f32.mrb[24].mxu1 }
 0x947   : > { %v2686_v14 = vadd.f32 %v2685_v13, %v2598_v12  ;;  %v3182_v15 = vpop.f32.mrb[25].mxu1 }
 0x948   : > { %v2688_v16 = vpop.f32.mrb[26].mxu1 }
 0x949   : > { %v2691_v17 = vmax.f32 %v2686_v14, 0.0  ;;  %v3183_v18 = vpop.f32.mrb[27].mxu1 }
 0x94b   : > { %v2692_v19 = vpack.c.bf16 %v2691_v17, %v2691_v17 }
 0x94d   : > { %3197 = vmatmul.mubr.msk.bf16.vlgmr.msra.gmra.mrb[28].mxu0 %vm1475_vm11, %v2692_v19 }
 0xa20   : > { %v2778_v21 = vpop.f32.mrb[28].mxu0 }
 0xa21   : > { %v2779_v22 = vadd.f32 %v2778_v21, %v2704_v20  ;;  %v3198_v23 = vpop.f32.mrb[29].mxu0 }
 0xa22   : > { %v2781_v24 = vpop.f32.mrb[30].mxu0 }
 0xa23   : > { %v3199_v25 = vpop.f32.mrb[31].mxu0  ;;  %2785 = vst.msk [vmem:[%s486_s21] sm:$0x1] %vm2784_vm5, %v2779_v22 }
 0xa24   : > { %3542 = shalt.err (!%p3539_p3)
}
 0xa25   : > { %s3543_s16 = scalar_lea.hbm %s4495_s24, 16  ;;  %s3547_s21 = scalar_lea.hbm %s4569_s25, 32 }
 0xa26   : > { %p3544_p4 = scmp.ne.s32.totalorder %s4495_s24, %s3543_s16  ;;  %p3548_p9 = scmp.lt.u32.totalorder %s4495_s24, %s4569_s25 }
 0xa27   : > { %p3549_p10 = scmp.lt.u32.totalorder %s3547_s21, %s3543_s16  ;;  %p3551_p12 = scmp.lt.u32.totalorder %s3543_s16, %s4495_s24 }
 0xa28   : > { %p3545_p7 = pnand %p3544_p4, %p3723_p5 }
 0xa29   : > { %p3550_p11 = por %p3549_p10, %p3548_p9 }
 0xa2a   : > { %p3546_p8 = pneg %p3545_p7 }
 0xa2b   : > { %p3552_p13 = por %p3551_p12, %p3550_p11 }
 0xa2d   : > { %p3553_p0 = pnand %p3552_p13, %p3546_p8 }
 0xa2f   : > { %3556 = shalt.err (!%p3553_p0)
}
 0xa30   : > { %3224 = dma.vmem_to_hbm [thread:$0]  (%p3723_p5), %s4497_s15, 16, %s4495_s24, %s2787_s22  }
 0xa31 PF: > { %s4570_s27 = sld [smem:[#allocation7_spill]]  ;;  %s4571_s23 = sld [smem:[#allocation5_spill]] }
 0xa37   : > { %p3230_p1 = scmp.ge.s32.totalorder %s4570_s27, 2  ;;  %s2811_s17 = sand.u32 1, %s4571_s23  }
 0xa38   : > { %s2812_s18 = scalar_lea.sflag [#allocation3], %s2811_s17 }
 0xa39   : > { %p3227_p2 = pnand %p3230_p1, %p3727_p6 }
 0xa3b   : > { %3574 = dma.done.wait (!%p3227_p2), %s2812_s18, 16  }
 0xa3c   : > { %3576 = vsyncadd (!%p3227_p2), %s2812_s18, 4294967280  ;;  %s4573_s21 = sld [smem:[#allocation8_spill]]  ;;  %s4574_s16 = sld [smem:[#allocation6_spill]] }
 0xa3d   : > { %s4575_s20 = sld [smem:[#allocation9_spill]]  ;;  %s4576_s18 = smov %s3583_s19 }
 0xa42   : > { %p25_p3 = scmp.ge.s32.totalorder %s4573_s21, 4   ;;  %s4577_s19 = smov %s4574_s16 }
 0xa44   :  { %27 = sbr.rel (!%p25_p3) target bundleno = 5 (0x5), region = 119 }
 0xa4b   :  { %2816 = vsyncpa [#allocation3], 1 }
 0xa4c   :  { %2818 = vsyncpa [#allocation3 + $0x1], 1 }

</bundles_post_ra>
